<compile_context>
chip_gen: v7x
topology: tpu7x:2x2x1
jax: 0.10.0
libtpu: 0.0.40
codegen_flags: <defaults>
</compile_context>

<pallas_src>
import jax
import jax.numpy as jnp
from jax.experimental import pallas as pl
from jax.experimental.pallas import tpu as pltpu

# ---------------- model dims (small, TPU-tile friendly) ----------------
NC = 2              # batch chunks (grid axis; "parallel" -> v7x megacore)
BC = 8              # batch rows per chunk
BATCH = NC * BC     # total batch
T = 8               # caption length
E = 128             # embedding_dim
H = 128             # hidden_dim
F = 256             # num_features
V = 256             # n_tokens (vocab)


# ---------------------------- Pallas kernel ----------------------------
def decoder_kernel(
    embed_ref,                # (T*BC, E)  bf16 time-major word embeddings
    feat_ref,                 # (BC, F)    f32 encoder features (this chunk)
    wihw_ref,                 # (E, 4H)    bf16 word half of W_ih^T   (i,f,o,g)
    wihf_ref,                 # (F, 4H)    bf16 feats half of W_ih^T  (i,f,o,g)
    bgate_ref,                # (1, 4H)    f32  bih + bhh             (i,f,o,g)
    whh_ref,                  # (H, 4H)    bf16 W_hh^T                (i,f,o,g)
    fcw_ref, fcb_ref,         # (H, V) bf16, (1, V) f32
    ihw_ref, ihb_ref,         # (F, H) f32,  (1, H) f32   init_h
    icw_ref, icb_ref,         # (F, H) f32,  (1, H) f32   init_c
    out_ref,                  # (T*BC, V)  f32 logits (time-major)
    gx_scr,                   # VMEM (T*BC, 4H) f32: input-side gate preacts
):
    feats = feat_ref[...]                                        # (BC, F)

    # ---- init_hidden: mean over the length-1 annotation axis == feats ----
    h = (jnp.dot(feats, ihw_ref[...], preferred_element_type=jnp.float32)
         + ihb_ref[...])                                         # (BC, H)
    c = (jnp.dot(feats, icw_ref[...], preferred_element_type=jnp.float32)
         + icb_ref[...])                                         # (BC, H)

    # ---- Bahdanau attention over the length-1 annotation axis ----
    # softmax over a single element is exactly 1 => context == feats; the
    # W_a/U_a/v_a branch cannot affect the returned logits and is elided.

    # ---- input-side gate pre-activations for all T steps, hoisted;
    #      constant feats-half + (bih + bhh) folded in once.               ----
    feats_bf = feats.astype(jnp.bfloat16)
    g_const = (jnp.dot(feats_bf, wihf_ref[...],
                       preferred_element_type=jnp.float32)
               + bgate_ref[...])                                 # (BC, 4H)
    gx = jnp.dot(embed_ref[...], wihw_ref[...],
                 preferred_element_type=jnp.float32)             # (T*BC, 4H)
    gx_scr[...] = (gx.reshape(T, BC, 4 * H) + g_const[None]).reshape(T * BC,
                                                                     4 * H)

    whh = whh_ref[...]                                           # (H, 4H) bf16

    # ---- serial recurrence, fully unrolled (T static & small).
    #      Loop body = one small matmul + one add + activations.           ----
    hs = []
    for t in range(T):
        gates = (gx_scr[t * BC:(t + 1) * BC, :]
                 + jnp.dot(h.astype(jnp.bfloat16), whh,
                           preferred_element_type=jnp.float32))  # (BC, 4H)
        # columns are (i, f, o, g): one wide sigmoid for i/f/o, tanh for g.
        sig = 0.5 * (jnp.tanh(0.5 * gates[:, :3 * H]) + 1.0)     # (BC, 3H)
        i_g = sig[:, 0:H]
        f_g = sig[:, H:2 * H]
        o_g = sig[:, 2 * H:3 * H]
        g_g = jnp.tanh(gates[:, 3 * H:])
        c = f_g * c + i_g * g_g
        h = o_g * jnp.tanh(c)            # dropout(p=0.5) -> identity (eval)
        hs.append(h)

    # ---- output projection batched over all T steps: (T*BC, H) @ (H, V) ----
    h_all = jnp.concatenate(hs, axis=0).astype(jnp.bfloat16)     # (T*BC, H)
    out_ref[...] = (jnp.dot(h_all, fcw_ref[...],
                            preferred_element_type=jnp.float32)
                    + fcb_ref[...])


# ------------------------------- wrapper --------------------------------
def _perm_gates(w):
    """Reorder gate columns (i, f, g, o) -> (i, f, o, g)."""
    return jnp.concatenate([w[:, :2 * H], w[:, 3 * H:], w[:, 2 * H:3 * H]],
                           axis=1)


@jax.jit
def decoder_rnn_forward(features, captions, params):
    """features: (BATCH, F) f32, captions: (BATCH, T) i32 -> (BATCH, T, V) f32."""
    # weight prep: gate-column permutation, bf16 operand casts, bias pre-sum
    wih_p = _perm_gates(params["wih"])                    # (E+F, 4H)
    wihw = wih_p[:E].astype(jnp.bfloat16)                 # (E, 4H)
    wihf = wih_p[E:].astype(jnp.bfloat16)                 # (F, 4H)
    bgate = _perm_gates(params["bih"] + params["bhh"])    # (1, 4H) f32
    whh = _perm_gates(params["whh"]).astype(jnp.bfloat16) # (H, 4H)
    fcw = params["fcw"].astype(jnp.bfloat16)              # (H, V)

    # time-major, chunk-major embedding gather straight from a bf16 table
    emb_b = params["emb"].astype(jnp.bfloat16)            # (V, E)
    cap_tm = jnp.transpose(captions.reshape(NC, BC, T), (0, 2, 1))  # (NC,T,BC)
    embed_tm = emb_b[cap_tm].reshape(NC * T * BC, E)      # bf16

    weights = [wihw, wihf, bgate, whh, fcw, params["fcb"],
               params["ihw"], params["ihb"], params["icw"], params["icb"]]

    grid_spec = pltpu.PrefetchScalarGridSpec(
        num_scalar_prefetch=0,
        grid=(NC,),                                       # batch chunks
        in_specs=[pl.BlockSpec((T * BC, E), lambda i: (i, 0)),   # embeddings
                  pl.BlockSpec((BC, F), lambda i: (i, 0))]       # features
                 + [pl.BlockSpec(w.shape, lambda i: (0, 0))      # weights stay
                    for w in weights],                           # resident
        out_specs=pl.BlockSpec((T * BC, V), lambda i: (i, 0)),
        scratch_shapes=[pltpu.VMEM((T * BC, 4 * H), jnp.float32)],
    )

    out_flat = pl.pallas_call(
        decoder_kernel,
        out_shape=jax.ShapeDtypeStruct((NC * T * BC, V), jnp.float32),
        grid_spec=grid_spec,
        compiler_params=pltpu.CompilerParams(
            dimension_semantics=("parallel",)),           # v7x: 2 TCs, 1 chunk each
    )(embed_tm, features, *weights)

    # (NC, T, BC, V) -> (BATCH, T, V)
    return jnp.transpose(out_flat.reshape(NC, T, BC, V),
                         (0, 2, 1, 3)).reshape(BATCH, T, V)


# ------------------------- pure-JAX references --------------------------
# Full-precision reference keeping the (mathematically inert) attention path.
def decoder_rnn_reference(features, captions, params):
    emb = params["emb"][captions]                         # (B, T, E)
    h = features @ params["ihw"] + params["ihb"][0]
    c = features @ params["icw"] + params["icb"][0]
    outs = []
    for t in range(captions.shape[1]):
        a1 = features @ params["waw"] + params["wab"][0]
        a2 = h @ params["uaw"] + params["uab"][0]
        att = jnp.tanh(a1 + a2)
        score = att @ params["vaw"] + params["vab"][0]    # (B, 1)
        w = jnp.exp(score - score)                        # softmax over len-1 axis
        context = w * features
        x = jnp.concatenate([emb[:, t, :], context], axis=1)
        gates = (x @ params["wih"] + params["bih"][0]
                 + h @ params["whh"] + params["bhh"][0])
        i_g, f_g, g_g, o_g = jnp.split(gates, 4, axis=1)
        i_g = jax.nn.sigmoid(i_g)
        f_g = jax.nn.sigmoid(f_g)
        g_g = jnp.tanh(g_g)
        o_g = jax.nn.sigmoid(o_g)
        c = f_g * c + i_g * g_g
        h = o_g * jnp.tanh(c)
        outs.append(h @ params["fcw"] + params["fcb"][0])
    return jnp.stack(outs, axis=1)


# Numerics-matched reference: same bf16 matmul operands / f32 accumulation as
# the kernel (used for the tight correctness check).
def decoder_rnn_reference_bf16mm(features, captions, params):
    bf = jnp.bfloat16
    emb_b = params["emb"].astype(bf)
    wih_b = params["wih"].astype(bf)
    whh_b = params["whh"].astype(bf)
    fcw_b = params["fcw"].astype(bf)
    h = features @ params["ihw"] + params["ihb"][0]
    c = features @ params["icw"] + params["icb"][0]
    outs = []
    for t in range(captions.shape[1]):
        context = features                               # len-1 softmax == 1
        x = jnp.concatenate([emb_b[captions[:, t]].astype(jnp.float32),
                             context], axis=1)
        gates = (jnp.dot(x.astype(bf), wih_b, preferred_element_type=jnp.float32)
                 + params["bih"][0]
                 + jnp.dot(h.astype(bf), whh_b, preferred_element_type=jnp.float32)
                 + params["bhh"][0])
        i_g, f_g, g_g, o_g = jnp.split(gates, 4, axis=1)
        i_g = jax.nn.sigmoid(i_g)
        f_g = jax.nn.sigmoid(f_g)
        g_g = jnp.tanh(g_g)
        o_g = jax.nn.sigmoid(o_g)
        c = f_g * c + i_g * g_g
        h = o_g * jnp.tanh(c)
        outs.append(jnp.dot(h.astype(bf), fcw_b,
                            preferred_element_type=jnp.float32)
                    + params["fcb"][0])
    return jnp.stack(outs, axis=1)


# ----------------------- deterministic param init ----------------------
def init_params(key):
    ks = jax.random.split(key, 24)

    def lin_w(k, in_dim, out_dim):
        bound = float(in_dim) ** -0.5
        return jax.random.uniform(k, (in_dim, out_dim), jnp.float32,
                                  -bound, bound)

    def lin_b(k, in_dim, out_dim):
        bound = float(in_dim) ** -0.5
        return jax.random.uniform(k, (1, out_dim), jnp.float32, -bound, bound)

    p = {}
    p["emb"] = jax.random.normal(ks[0], (V, E), jnp.float32) * 0.1
    # attention (kept for the reference; dead path in the kernel)
    p["waw"], p["wab"] = lin_w(ks[1], F, H), lin_b(ks[2], F, H)
    p["uaw"], p["uab"] = lin_w(ks[3], H, H), lin_b(ks[4], H, H)
    p["vaw"], p["vab"] = lin_w(ks[5], H, 1), lin_b(ks[6], H, 1)
    # LSTMCell (PyTorch init scale 1/sqrt(hidden_dim)); stored pre-transposed,
    # gate order (i, f, g, o) as in torch.nn.LSTMCell.
    bound = float(H) ** -0.5
    p["wih"] = jax.random.uniform(ks[7], (E + F, 4 * H), jnp.float32,
                                  -bound, bound)
    p["bih"] = jax.random.uniform(ks[8], (1, 4 * H), jnp.float32,
                                  -bound, bound)
    p["whh"] = jax.random.uniform(ks[9], (H, 4 * H), jnp.float32,
                                  -bound, bound)
    p["bhh"] = jax.random.uniform(ks[10], (1, 4 * H), jnp.float32,
                                  -bound, bound)
    # output projection
    p["fcw"], p["fcb"] = lin_w(ks[11], H, V), lin_b(ks[12], H, V)
    # init_h / init_c
    p["ihw"], p["ihb"] = lin_w(ks[13], F, H), lin_b(ks[14], F, H)
    p["icw"], p["icb"] = lin_w(ks[15], F, H), lin_b(ks[16], F, H)
    return p


if __name__ == "__main__":
    key = jax.random.PRNGKey(0)
    k_par, k_feat, k_cap = jax.random.split(key, 3)

    params = init_params(k_par)
    features = jax.random.normal(k_feat, (BATCH, F), jnp.float32)
    captions = jax.random.randint(k_cap, (BATCH, T), 0, V, jnp.int32)

    out = decoder_rnn_forward(features, captions, params)
    out = jax.block_until_ready(out)
    assert out.shape == (BATCH, T, V)

    # Tight check vs. a reference with identical bf16-operand matmul numerics.
    ref_bf = decoder_rnn_reference_bf16mm(features, captions, params)
    assert jnp.allclose(out, ref_bf, atol=1e-2, rtol=1e-2)

    # Looser check vs. the full-precision module semantics (bf16 MXU operands
    # introduce ~1e-2-level absolute differences in the logits).
    ref_f32 = decoder_rnn_reference(features, captions, params)
    assert jnp.allclose(out, ref_f32, atol=1e-1, rtol=1e-1)

    print("KERNEL_OK")
</pallas_src>

<mosaic_0001>
module attributes {stable_mosaic.version = 11 : i64} {
  func.func @decoder_kernel(%arg0: i32, %arg1: memref<64x128xbf16, #tpu.memory_space<vmem>>, %arg2: memref<8x256xf32, #tpu.memory_space<vmem>>, %arg3: memref<128x512xbf16, #tpu.memory_space<vmem>>, %arg4: memref<256x512xbf16, #tpu.memory_space<vmem>>, %arg5: memref<1x512xf32, #tpu.memory_space<vmem>>, %arg6: memref<128x512xbf16, #tpu.memory_space<vmem>>, %arg7: memref<128x256xbf16, #tpu.memory_space<vmem>>, %arg8: memref<1x256xf32, #tpu.memory_space<vmem>>, %arg9: memref<256x128xf32, #tpu.memory_space<vmem>>, %arg10: memref<1x128xf32, #tpu.memory_space<vmem>>, %arg11: memref<256x128xf32, #tpu.memory_space<vmem>>, %arg12: memref<1x128xf32, #tpu.memory_space<vmem>>, %arg13: memref<64x256xf32, #tpu.memory_space<vmem>>, %arg14: memref<64x512xf32, #tpu.memory_space<vmem>>) attributes {dimension_semantics = [#tpu.dimension_semantics<parallel>], iteration_bounds = array<i64: 2>, scalar_prefetch = 0 : i64, scratch_operands = 1 : i64, tpu.core_type = #tpu.core_type<tc>, window_params = [{transform_indices = @transform_0, window_bounds = array<i64: 64, 128>}, {transform_indices = @transform_1, window_bounds = array<i64: 8, 256>}, {pipeline_mode = #tpu.pipeline_mode<synchronous>, transform_indices = @transform_2, window_bounds = array<i64: 128, 512>}, {pipeline_mode = #tpu.pipeline_mode<synchronous>, transform_indices = @transform_3, window_bounds = array<i64: 256, 512>}, {pipeline_mode = #tpu.pipeline_mode<synchronous>, transform_indices = @transform_4, window_bounds = array<i64: 1, 512>}, {pipeline_mode = #tpu.pipeline_mode<synchronous>, transform_indices = @transform_5, window_bounds = array<i64: 128, 512>}, {pipeline_mode = #tpu.pipeline_mode<synchronous>, transform_indices = @transform_6, window_bounds = array<i64: 128, 256>}, {pipeline_mode = #tpu.pipeline_mode<synchronous>, transform_indices = @transform_7, window_bounds = array<i64: 1, 256>}, {pipeline_mode = #tpu.pipeline_mode<synchronous>, transform_indices = @transform_8, window_bounds = array<i64: 256, 128>}, {pipeline_mode = #tpu.pipeline_mode<synchronous>, transform_indices = @transform_9, window_bounds = array<i64: 1, 128>}, {pipeline_mode = #tpu.pipeline_mode<synchronous>, transform_indices = @transform_10, window_bounds = array<i64: 256, 128>}, {pipeline_mode = #tpu.pipeline_mode<synchronous>, transform_indices = @transform_11, window_bounds = array<i64: 1, 128>}, {transform_indices = @transform_12, window_bounds = array<i64: 64, 256>}]} {
    %c0 = arith.constant 0 : index
    %c0_0 = arith.constant 0 : index
    %0 = vector.load %arg2[%c0, %c0_0] : memref<8x256xf32, #tpu.memory_space<vmem>>, vector<8x256xf32>
    %c0_1 = arith.constant 0 : index
    %c0_2 = arith.constant 0 : index
    %1 = vector.load %arg9[%c0_1, %c0_2] : memref<256x128xf32, #tpu.memory_space<vmem>>, vector<256x128xf32>
    %cst = arith.constant dense<0.000000e+00> : vector<8x128xf32>
    %2 = tpu.matmul %0, %1, %cst {dimension_numbers = #tpu.dot_dimension_numbers<[1], [0], [0], [1], [0, 0, 1, 1], [], []>} : vector<8x256xf32>, vector<256x128xf32>, vector<8x128xf32> -> vector<8x128xf32>
    %c0_3 = arith.constant 0 : index
    %c0_4 = arith.constant 0 : index
    %3 = vector.load %arg10[%c0_3, %c0_4] : memref<1x128xf32, #tpu.memory_space<vmem>>, vector<1x128xf32>
    %4 = vector.broadcast %3 : vector<1x128xf32> to vector<8x128xf32>
    %5 = arith.addf %2, %4 : vector<8x128xf32>
    %c0_5 = arith.constant 0 : index
    %c0_6 = arith.constant 0 : index
    %6 = vector.load %arg11[%c0_5, %c0_6] : memref<256x128xf32, #tpu.memory_space<vmem>>, vector<256x128xf32>
    %cst_7 = arith.constant dense<0.000000e+00> : vector<8x128xf32>
    %7 = tpu.matmul %0, %6, %cst_7 {dimension_numbers = #tpu.dot_dimension_numbers<[1], [0], [0], [1], [0, 0, 1, 1], [], []>} : vector<8x256xf32>, vector<256x128xf32>, vector<8x128xf32> -> vector<8x128xf32>
    %c0_8 = arith.constant 0 : index
    %c0_9 = arith.constant 0 : index
    %8 = vector.load %arg12[%c0_8, %c0_9] : memref<1x128xf32, #tpu.memory_space<vmem>>, vector<1x128xf32>
    %9 = vector.broadcast %8 : vector<1x128xf32> to vector<8x128xf32>
    %10 = arith.addf %7, %9 : vector<8x128xf32>
    %11 = arith.truncf %0 : vector<8x256xf32> to vector<8x256xbf16>
    %c0_10 = arith.constant 0 : index
    %c0_11 = arith.constant 0 : index
    %12 = vector.load %arg4[%c0_10, %c0_11] : memref<256x512xbf16, #tpu.memory_space<vmem>>, vector<256x512xbf16>
    %cst_12 = arith.constant dense<0.000000e+00> : vector<8x512xf32>
    %13 = tpu.matmul %11, %12, %cst_12 {dimension_numbers = #tpu.dot_dimension_numbers<[1], [0], [0], [1], [0, 0, 1, 1], [], []>} : vector<8x256xbf16>, vector<256x512xbf16>, vector<8x512xf32> -> vector<8x512xf32>
    %c0_13 = arith.constant 0 : index
    %c0_14 = arith.constant 0 : index
    %14 = vector.load %arg5[%c0_13, %c0_14] : memref<1x512xf32, #tpu.memory_space<vmem>>, vector<1x512xf32>
    %15 = vector.broadcast %14 : vector<1x512xf32> to vector<8x512xf32>
    %16 = arith.addf %13, %15 : vector<8x512xf32>
    %c0_15 = arith.constant 0 : index
    %c0_16 = arith.constant 0 : index
    %17 = vector.load %arg1[%c0_15, %c0_16] : memref<64x128xbf16, #tpu.memory_space<vmem>>, vector<64x128xbf16>
    %c0_17 = arith.constant 0 : index
    %c0_18 = arith.constant 0 : index
    %18 = vector.load %arg3[%c0_17, %c0_18] : memref<128x512xbf16, #tpu.memory_space<vmem>>, vector<128x512xbf16>
    %cst_19 = arith.constant dense<0.000000e+00> : vector<64x512xf32>
    %19 = tpu.matmul %17, %18, %cst_19 {dimension_numbers = #tpu.dot_dimension_numbers<[1], [0], [0], [1], [0, 0, 1, 1], [], []>} : vector<64x128xbf16>, vector<128x512xbf16>, vector<64x512xf32> -> vector<64x512xf32>
    %20 = vector.shape_cast %19 : vector<64x512xf32> to vector<8x8x512xf32>
    %21 = vector.shape_cast %16 : vector<8x512xf32> to vector<1x8x512xf32>
    %22 = vector.broadcast %21 : vector<1x8x512xf32> to vector<8x8x512xf32>
    %23 = arith.addf %20, %22 : vector<8x8x512xf32>
    %24 = vector.shape_cast %23 : vector<8x8x512xf32> to vector<64x512xf32>
    %c0_20 = arith.constant 0 : index
    %c0_21 = arith.constant 0 : index
    %25 = vector.load %arg14[%c0_20, %c0_21] : memref<64x512xf32, #tpu.memory_space<vmem>>, vector<64x512xf32>
    tpu.vector_store %arg14[%c0_20, %c0_21], %24 {strides = array<i32>} : memref<64x512xf32, #tpu.memory_space<vmem>>, vector<64x512xf32>,
    %c0_22 = arith.constant 0 : index
    %c0_23 = arith.constant 0 : index
    %26 = vector.load %arg6[%c0_22, %c0_23] : memref<128x512xbf16, #tpu.memory_space<vmem>>, vector<128x512xbf16>
    %c0_24 = arith.constant 0 : index
    %c0_25 = arith.constant 0 : index
    %27 = vector.load %arg14[%c0_24, %c0_25] : memref<64x512xf32, #tpu.memory_space<vmem>>, vector<8x512xf32>
    %28 = arith.truncf %5 : vector<8x128xf32> to vector<8x128xbf16>
    %cst_26 = arith.constant dense<0.000000e+00> : vector<8x512xf32>
    %29 = tpu.matmul %28, %26, %cst_26 {dimension_numbers = #tpu.dot_dimension_numbers<[1], [0], [0], [1], [0, 0, 1, 1], [], []>} : vector<8x128xbf16>, vector<128x512xbf16>, vector<8x512xf32> -> vector<8x512xf32>
    %30 = arith.addf %27, %29 : vector<8x512xf32>
    %31 = vector.extract_strided_slice %30 {offsets = [0, 0], sizes = [8, 384], strides = [1, 1]} : vector<8x512xf32> to vector<8x384xf32>
    %cst_27 = arith.constant 5.000000e-01 : f32
    %32 = vector.broadcast %cst_27 : f32 to vector<8x384xf32>
    %33 = arith.mulf %32, %31 : vector<8x384xf32>
    %34 = math.tanh %33 : vector<8x384xf32>
    %cst_28 = arith.constant 1.000000e+00 : f32
    %35 = vector.broadcast %cst_28 : f32 to vector<8x384xf32>
    %36 = arith.addf %34, %35 : vector<8x384xf32>
    %cst_29 = arith.constant 5.000000e-01 : f32
    %37 = vector.broadcast %cst_29 : f32 to vector<8x384xf32>
    %38 = arith.mulf %37, %36 : vector<8x384xf32>
    %39 = vector.extract_strided_slice %38 {offsets = [0, 0], sizes = [8, 128], strides = [1, 1]} : vector<8x384xf32> to vector<8x128xf32>
    %40 = vector.extract_strided_slice %38 {offsets = [0, 128], sizes = [8, 128], strides = [1, 1]} : vector<8x384xf32> to vector<8x128xf32>
    %41 = vector.extract_strided_slice %38 {offsets = [0, 256], sizes = [8, 128], strides = [1, 1]} : vector<8x384xf32> to vector<8x128xf32>
    %42 = vector.extract_strided_slice %30 {offsets = [0, 384], sizes = [8, 128], strides = [1, 1]} : vector<8x512xf32> to vector<8x128xf32>
    %43 = math.tanh %42 : vector<8x128xf32>
    %44 = arith.mulf %40, %10 : vector<8x128xf32>
    %45 = arith.mulf %39, %43 : vector<8x128xf32>
    %46 = arith.addf %44, %45 : vector<8x128xf32>
    %47 = math.tanh %46 : vector<8x128xf32>
    %48 = arith.mulf %41, %47 : vector<8x128xf32>
    %c8 = arith.constant 8 : index
    %c0_30 = arith.constant 0 : index
    %49 = vector.load %arg14[%c8, %c0_30] : memref<64x512xf32, #tpu.memory_space<vmem>>, vector<8x512xf32>
    %50 = arith.truncf %48 : vector<8x128xf32> to vector<8x128xbf16>
    %cst_31 = arith.constant dense<0.000000e+00> : vector<8x512xf32>
    %51 = tpu.matmul %50, %26, %cst_31 {dimension_numbers = #tpu.dot_dimension_numbers<[1], [0], [0], [1], [0, 0, 1, 1], [], []>} : vector<8x128xbf16>, vector<128x512xbf16>, vector<8x512xf32> -> vector<8x512xf32>
    %52 = arith.addf %49, %51 : vector<8x512xf32>
    %53 = vector.extract_strided_slice %52 {offsets = [0, 0], sizes = [8, 384], strides = [1, 1]} : vector<8x512xf32> to vector<8x384xf32>
    %cst_32 = arith.constant 5.000000e-01 : f32
    %54 = vector.broadcast %cst_32 : f32 to vector<8x384xf32>
    %55 = arith.mulf %54, %53 : vector<8x384xf32>
    %56 = math.tanh %55 : vector<8x384xf32>
    %cst_33 = arith.constant 1.000000e+00 : f32
    %57 = vector.broadcast %cst_33 : f32 to vector<8x384xf32>
    %58 = arith.addf %56, %57 : vector<8x384xf32>
    %cst_34 = arith.constant 5.000000e-01 : f32
    %59 = vector.broadcast %cst_34 : f32 to vector<8x384xf32>
    %60 = arith.mulf %59, %58 : vector<8x384xf32>
    %61 = vector.extract_strided_slice %60 {offsets = [0, 0], sizes = [8, 128], strides = [1, 1]} : vector<8x384xf32> to vector<8x128xf32>
    %62 = vector.extract_strided_slice %60 {offsets = [0, 128], sizes = [8, 128], strides = [1, 1]} : vector<8x384xf32> to vector<8x128xf32>
    %63 = vector.extract_strided_slice %60 {offsets = [0, 256], sizes = [8, 128], strides = [1, 1]} : vector<8x384xf32> to vector<8x128xf32>
    %64 = vector.extract_strided_slice %52 {offsets = [0, 384], sizes = [8, 128], strides = [1, 1]} : vector<8x512xf32> to vector<8x128xf32>
    %65 = math.tanh %64 : vector<8x128xf32>
    %66 = arith.mulf %62, %46 : vector<8x128xf32>
    %67 = arith.mulf %61, %65 : vector<8x128xf32>
    %68 = arith.addf %66, %67 : vector<8x128xf32>
    %69 = math.tanh %68 : vector<8x128xf32>
    %70 = arith.mulf %63, %69 : vector<8x128xf32>
    %c16 = arith.constant 16 : index
    %c0_35 = arith.constant 0 : index
    %71 = vector.load %arg14[%c16, %c0_35] : memref<64x512xf32, #tpu.memory_space<vmem>>, vector<8x512xf32>
    %72 = arith.truncf %70 : vector<8x128xf32> to vector<8x128xbf16>
    %cst_36 = arith.constant dense<0.000000e+00> : vector<8x512xf32>
    %73 = tpu.matmul %72, %26, %cst_36 {dimension_numbers = #tpu.dot_dimension_numbers<[1], [0], [0], [1], [0, 0, 1, 1], [], []>} : vector<8x128xbf16>, vector<128x512xbf16>, vector<8x512xf32> -> vector<8x512xf32>
    %74 = arith.addf %71, %73 : vector<8x512xf32>
    %75 = vector.extract_strided_slice %74 {offsets = [0, 0], sizes = [8, 384], strides = [1, 1]} : vector<8x512xf32> to vector<8x384xf32>
    %cst_37 = arith.constant 5.000000e-01 : f32
    %76 = vector.broadcast %cst_37 : f32 to vector<8x384xf32>
    %77 = arith.mulf %76, %75 : vector<8x384xf32>
    %78 = math.tanh %77 : vector<8x384xf32>
    %cst_38 = arith.constant 1.000000e+00 : f32
    %79 = vector.broadcast %cst_38 : f32 to vector<8x384xf32>
    %80 = arith.addf %78, %79 : vector<8x384xf32>
    %cst_39 = arith.constant 5.000000e-01 : f32
    %81 = vector.broadcast %cst_39 : f32 to vector<8x384xf32>
    %82 = arith.mulf %81, %80 : vector<8x384xf32>
    %83 = vector.extract_strided_slice %82 {offsets = [0, 0], sizes = [8, 128], strides = [1, 1]} : vector<8x384xf32> to vector<8x128xf32>
    %84 = vector.extract_strided_slice %82 {offsets = [0, 128], sizes = [8, 128], strides = [1, 1]} : vector<8x384xf32> to vector<8x128xf32>
    %85 = vector.extract_strided_slice %82 {offsets = [0, 256], sizes = [8, 128], strides = [1, 1]} : vector<8x384xf32> to vector<8x128xf32>
    %86 = vector.extract_strided_slice %74 {offsets = [0, 384], sizes = [8, 128], strides = [1, 1]} : vector<8x512xf32> to vector<8x128xf32>
    %87 = math.tanh %86 : vector<8x128xf32>
    %88 = arith.mulf %84, %68 : vector<8x128xf32>
    %89 = arith.mulf %83, %87 : vector<8x128xf32>
    %90 = arith.addf %88, %89 : vector<8x128xf32>
    %91 = math.tanh %90 : vector<8x128xf32>
    %92 = arith.mulf %85, %91 : vector<8x128xf32>
    %c24 = arith.constant 24 : index
    %c0_40 = arith.constant 0 : index
    %93 = vector.load %arg14[%c24, %c0_40] : memref<64x512xf32, #tpu.memory_space<vmem>>, vector<8x512xf32>
    %94 = arith.truncf %92 : vector<8x128xf32> to vector<8x128xbf16>
    %cst_41 = arith.constant dense<0.000000e+00> : vector<8x512xf32>
    %95 = tpu.matmul %94, %26, %cst_41 {dimension_numbers = #tpu.dot_dimension_numbers<[1], [0], [0], [1], [0, 0, 1, 1], [], []>} : vector<8x128xbf16>, vector<128x512xbf16>, vector<8x512xf32> -> vector<8x512xf32>
    %96 = arith.addf %93, %95 : vector<8x512xf32>
    %97 = vector.extract_strided_slice %96 {offsets = [0, 0], sizes = [8, 384], strides = [1, 1]} : vector<8x512xf32> to vector<8x384xf32>
    %cst_42 = arith.constant 5.000000e-01 : f32
    %98 = vector.broadcast %cst_42 : f32 to vector<8x384xf32>
    %99 = arith.mulf %98, %97 : vector<8x384xf32>
    %100 = math.tanh %99 : vector<8x384xf32>
    %cst_43 = arith.constant 1.000000e+00 : f32
    %101 = vector.broadcast %cst_43 : f32 to vector<8x384xf32>
    %102 = arith.addf %100, %101 : vector<8x384xf32>
    %cst_44 = arith.constant 5.000000e-01 : f32
    %103 = vector.broadcast %cst_44 : f32 to vector<8x384xf32>
    %104 = arith.mulf %103, %102 : vector<8x384xf32>
    %105 = vector.extract_strided_slice %104 {offsets = [0, 0], sizes = [8, 128], strides = [1, 1]} : vector<8x384xf32> to vector<8x128xf32>
    %106 = vector.extract_strided_slice %104 {offsets = [0, 128], sizes = [8, 128], strides = [1, 1]} : vector<8x384xf32> to vector<8x128xf32>
    %107 = vector.extract_strided_slice %104 {offsets = [0, 256], sizes = [8, 128], strides = [1, 1]} : vector<8x384xf32> to vector<8x128xf32>
    %108 = vector.extract_strided_slice %96 {offsets = [0, 384], sizes = [8, 128], strides = [1, 1]} : vector<8x512xf32> to vector<8x128xf32>
    %109 = math.tanh %108 : vector<8x128xf32>
    %110 = arith.mulf %106, %90 : vector<8x128xf32>
    %111 = arith.mulf %105, %109 : vector<8x128xf32>
    %112 = arith.addf %110, %111 : vector<8x128xf32>
    %113 = math.tanh %112 : vector<8x128xf32>
    %114 = arith.mulf %107, %113 : vector<8x128xf32>
    %c32 = arith.constant 32 : index
    %c0_45 = arith.constant 0 : index
    %115 = vector.load %arg14[%c32, %c0_45] : memref<64x512xf32, #tpu.memory_space<vmem>>, vector<8x512xf32>
    %116 = arith.truncf %114 : vector<8x128xf32> to vector<8x128xbf16>
    %cst_46 = arith.constant dense<0.000000e+00> : vector<8x512xf32>
    %117 = tpu.matmul %116, %26, %cst_46 {dimension_numbers = #tpu.dot_dimension_numbers<[1], [0], [0], [1], [0, 0, 1, 1], [], []>} : vector<8x128xbf16>, vector<128x512xbf16>, vector<8x512xf32> -> vector<8x512xf32>
    %118 = arith.addf %115, %117 : vector<8x512xf32>
    %119 = vector.extract_strided_slice %118 {offsets = [0, 0], sizes = [8, 384], strides = [1, 1]} : vector<8x512xf32> to vector<8x384xf32>
    %cst_47 = arith.constant 5.000000e-01 : f32
    %120 = vector.broadcast %cst_47 : f32 to vector<8x384xf32>
    %121 = arith.mulf %120, %119 : vector<8x384xf32>
    %122 = math.tanh %121 : vector<8x384xf32>
    %cst_48 = arith.constant 1.000000e+00 : f32
    %123 = vector.broadcast %cst_48 : f32 to vector<8x384xf32>
    %124 = arith.addf %122, %123 : vector<8x384xf32>
    %cst_49 = arith.constant 5.000000e-01 : f32
    %125 = vector.broadcast %cst_49 : f32 to vector<8x384xf32>
    %126 = arith.mulf %125, %124 : vector<8x384xf32>
    %127 = vector.extract_strided_slice %126 {offsets = [0, 0], sizes = [8, 128], strides = [1, 1]} : vector<8x384xf32> to vector<8x128xf32>
    %128 = vector.extract_strided_slice %126 {offsets = [0, 128], sizes = [8, 128], strides = [1, 1]} : vector<8x384xf32> to vector<8x128xf32>
    %129 = vector.extract_strided_slice %126 {offsets = [0, 256], sizes = [8, 128], strides = [1, 1]} : vector<8x384xf32> to vector<8x128xf32>
    %130 = vector.extract_strided_slice %118 {offsets = [0, 384], sizes = [8, 128], strides = [1, 1]} : vector<8x512xf32> to vector<8x128xf32>
    %131 = math.tanh %130 : vector<8x128xf32>
    %132 = arith.mulf %128, %112 : vector<8x128xf32>
    %133 = arith.mulf %127, %131 : vector<8x128xf32>
    %134 = arith.addf %132, %133 : vector<8x128xf32>
    %135 = math.tanh %134 : vector<8x128xf32>
    %136 = arith.mulf %129, %135 : vector<8x128xf32>
    %c40 = arith.constant 40 : index
    %c0_50 = arith.constant 0 : index
    %137 = vector.load %arg14[%c40, %c0_50] : memref<64x512xf32, #tpu.memory_space<vmem>>, vector<8x512xf32>
    %138 = arith.truncf %136 : vector<8x128xf32> to vector<8x128xbf16>
    %cst_51 = arith.constant dense<0.000000e+00> : vector<8x512xf32>
    %139 = tpu.matmul %138, %26, %cst_51 {dimension_numbers = #tpu.dot_dimension_numbers<[1], [0], [0], [1], [0, 0, 1, 1], [], []>} : vector<8x128xbf16>, vector<128x512xbf16>, vector<8x512xf32> -> vector<8x512xf32>
    %140 = arith.addf %137, %139 : vector<8x512xf32>
    %141 = vector.extract_strided_slice %140 {offsets = [0, 0], sizes = [8, 384], strides = [1, 1]} : vector<8x512xf32> to vector<8x384xf32>
    %cst_52 = arith.constant 5.000000e-01 : f32
    %142 = vector.broadcast %cst_52 : f32 to vector<8x384xf32>
    %143 = arith.mulf %142, %141 : vector<8x384xf32>
    %144 = math.tanh %143 : vector<8x384xf32>
    %cst_53 = arith.constant 1.000000e+00 : f32
    %145 = vector.broadcast %cst_53 : f32 to vector<8x384xf32>
    %146 = arith.addf %144, %145 : vector<8x384xf32>
    %cst_54 = arith.constant 5.000000e-01 : f32
    %147 = vector.broadcast %cst_54 : f32 to vector<8x384xf32>
    %148 = arith.mulf %147, %146 : vector<8x384xf32>
    %149 = vector.extract_strided_slice %148 {offsets = [0, 0], sizes = [8, 128], strides = [1, 1]} : vector<8x384xf32> to vector<8x128xf32>
    %150 = vector.extract_strided_slice %148 {offsets = [0, 128], sizes = [8, 128], strides = [1, 1]} : vector<8x384xf32> to vector<8x128xf32>
    %151 = vector.extract_strided_slice %148 {offsets = [0, 256], sizes = [8, 128], strides = [1, 1]} : vector<8x384xf32> to vector<8x128xf32>
    %152 = vector.extract_strided_slice %140 {offsets = [0, 384], sizes = [8, 128], strides = [1, 1]} : vector<8x512xf32> to vector<8x128xf32>
    %153 = math.tanh %152 : vector<8x128xf32>
    %154 = arith.mulf %150, %134 : vector<8x128xf32>
    %155 = arith.mulf %149, %153 : vector<8x128xf32>
    %156 = arith.addf %154, %155 : vector<8x128xf32>
    %157 = math.tanh %156 : vector<8x128xf32>
    %158 = arith.mulf %151, %157 : vector<8x128xf32>
    %c48 = arith.constant 48 : index
    %c0_55 = arith.constant 0 : index
    %159 = vector.load %arg14[%c48, %c0_55] : memref<64x512xf32, #tpu.memory_space<vmem>>, vector<8x512xf32>
    %160 = arith.truncf %158 : vector<8x128xf32> to vector<8x128xbf16>
    %cst_56 = arith.constant dense<0.000000e+00> : vector<8x512xf32>
    %161 = tpu.matmul %160, %26, %cst_56 {dimension_numbers = #tpu.dot_dimension_numbers<[1], [0], [0], [1], [0, 0, 1, 1], [], []>} : vector<8x128xbf16>, vector<128x512xbf16>, vector<8x512xf32> -> vector<8x512xf32>
    %162 = arith.addf %159, %161 : vector<8x512xf32>
    %163 = vector.extract_strided_slice %162 {offsets = [0, 0], sizes = [8, 384], strides = [1, 1]} : vector<8x512xf32> to vector<8x384xf32>
    %cst_57 = arith.constant 5.000000e-01 : f32
    %164 = vector.broadcast %cst_57 : f32 to vector<8x384xf32>
    %165 = arith.mulf %164, %163 : vector<8x384xf32>
    %166 = math.tanh %165 : vector<8x384xf32>
    %cst_58 = arith.constant 1.000000e+00 : f32
    %167 = vector.broadcast %cst_58 : f32 to vector<8x384xf32>
    %168 = arith.addf %166, %167 : vector<8x384xf32>
    %cst_59 = arith.constant 5.000000e-01 : f32
    %169 = vector.broadcast %cst_59 : f32 to vector<8x384xf32>
    %170 = arith.mulf %169, %168 : vector<8x384xf32>
    %171 = vector.extract_strided_slice %170 {offsets = [0, 0], sizes = [8, 128], strides = [1, 1]} : vector<8x384xf32> to vector<8x128xf32>
    %172 = vector.extract_strided_slice %170 {offsets = [0, 128], sizes = [8, 128], strides = [1, 1]} : vector<8x384xf32> to vector<8x128xf32>
    %173 = vector.extract_strided_slice %170 {offsets = [0, 256], sizes = [8, 128], strides = [1, 1]} : vector<8x384xf32> to vector<8x128xf32>
    %174 = vector.extract_strided_slice %162 {offsets = [0, 384], sizes = [8, 128], strides = [1, 1]} : vector<8x512xf32> to vector<8x128xf32>
    %175 = math.tanh %174 : vector<8x128xf32>
    %176 = arith.mulf %172, %156 : vector<8x128xf32>
    %177 = arith.mulf %171, %175 : vector<8x128xf32>
    %178 = arith.addf %176, %177 : vector<8x128xf32>
    %179 = math.tanh %178 : vector<8x128xf32>
    %180 = arith.mulf %173, %179 : vector<8x128xf32>
    %c56 = arith.constant 56 : index
    %c0_60 = arith.constant 0 : index
    %181 = vector.load %arg14[%c56, %c0_60] : memref<64x512xf32, #tpu.memory_space<vmem>>, vector<8x512xf32>
    %182 = arith.truncf %180 : vector<8x128xf32> to vector<8x128xbf16>
    %cst_61 = arith.constant dense<0.000000e+00> : vector<8x512xf32>
    %183 = tpu.matmul %182, %26, %cst_61 {dimension_numbers = #tpu.dot_dimension_numbers<[1], [0], [0], [1], [0, 0, 1, 1], [], []>} : vector<8x128xbf16>, vector<128x512xbf16>, vector<8x512xf32> -> vector<8x512xf32>
    %184 = arith.addf %181, %183 : vector<8x512xf32>
    %185 = vector.extract_strided_slice %184 {offsets = [0, 0], sizes = [8, 384], strides = [1, 1]} : vector<8x512xf32> to vector<8x384xf32>
    %cst_62 = arith.constant 5.000000e-01 : f32
    %186 = vector.broadcast %cst_62 : f32 to vector<8x384xf32>
    %187 = arith.mulf %186, %185 : vector<8x384xf32>
    %188 = math.tanh %187 : vector<8x384xf32>
    %cst_63 = arith.constant 1.000000e+00 : f32
    %189 = vector.broadcast %cst_63 : f32 to vector<8x384xf32>
    %190 = arith.addf %188, %189 : vector<8x384xf32>
    %cst_64 = arith.constant 5.000000e-01 : f32
    %191 = vector.broadcast %cst_64 : f32 to vector<8x384xf32>
    %192 = arith.mulf %191, %190 : vector<8x384xf32>
    %193 = vector.extract_strided_slice %192 {offsets = [0, 0], sizes = [8, 128], strides = [1, 1]} : vector<8x384xf32> to vector<8x128xf32>
    %194 = vector.extract_strided_slice %192 {offsets = [0, 128], sizes = [8, 128], strides = [1, 1]} : vector<8x384xf32> to vector<8x128xf32>
    %195 = vector.extract_strided_slice %192 {offsets = [0, 256], sizes = [8, 128], strides = [1, 1]} : vector<8x384xf32> to vector<8x128xf32>
    %196 = vector.extract_strided_slice %184 {offsets = [0, 384], sizes = [8, 128], strides = [1, 1]} : vector<8x512xf32> to vector<8x128xf32>
    %197 = math.tanh %196 : vector<8x128xf32>
    %198 = arith.mulf %194, %178 : vector<8x128xf32>
    %199 = arith.mulf %193, %197 : vector<8x128xf32>
    %200 = arith.addf %198, %199 : vector<8x128xf32>
    %201 = math.tanh %200 : vector<8x128xf32>
    %202 = arith.mulf %195, %201 : vector<8x128xf32>
    %203 = tpu.concatenate %48, %70, %92, %114, %136, %158, %180, %202 in 0 : vector<8x128xf32>, vector<8x128xf32>, vector<8x128xf32>, vector<8x128xf32>, vector<8x128xf32>, vector<8x128xf32>, vector<8x128xf32>, vector<8x128xf32> -> vector<64x128xf32>
    %204 = arith.truncf %203 : vector<64x128xf32> to vector<64x128xbf16>
    %c0_65 = arith.constant 0 : index
    %c0_66 = arith.constant 0 : index
    %205 = vector.load %arg7[%c0_65, %c0_66] : memref<128x256xbf16, #tpu.memory_space<vmem>>, vector<128x256xbf16>
    %cst_67 = arith.constant dense<0.000000e+00> : vector<64x256xf32>
    %206 = tpu.matmul %204, %205, %cst_67 {dimension_numbers = #tpu.dot_dimension_numbers<[1], [0], [0], [1], [0, 0, 1, 1], [], []>} : vector<64x128xbf16>, vector<128x256xbf16>, vector<64x256xf32> -> vector<64x256xf32>
    %c0_68 = arith.constant 0 : index
    %c0_69 = arith.constant 0 : index
    %207 = vector.load %arg8[%c0_68, %c0_69] : memref<1x256xf32, #tpu.memory_space<vmem>>, vector<1x256xf32>
    %208 = vector.broadcast %207 : vector<1x256xf32> to vector<64x256xf32>
    %209 = arith.addf %206, %208 : vector<64x256xf32>
    %c0_70 = arith.constant 0 : index
    %c0_71 = arith.constant 0 : index
    %210 = vector.load %arg13[%c0_70, %c0_71] : memref<64x256xf32, #tpu.memory_space<vmem>>, vector<64x256xf32>
    tpu.vector_store %arg13[%c0_70, %c0_71], %209 {strides = array<i32>} : memref<64x256xf32, #tpu.memory_space<vmem>>, vector<64x256xf32>,
    return
  }
  func.func @transform_0(%arg0: i32) -> (i32, i32) {
    %c0_i32 = arith.constant 0 : i32
    %c0_i32_0 = arith.constant 0 : i32
    return %arg0, %c0_i32 : i32, i32
  }
  func.func @transform_1(%arg0: i32) -> (i32, i32) {
    %c0_i32 = arith.constant 0 : i32
    %c0_i32_0 = arith.constant 0 : i32
    return %arg0, %c0_i32 : i32, i32
  }
  func.func @transform_2(%arg0: i32) -> (i32, i32) {
    %c0_i32 = arith.constant 0 : i32
    %c0_i32_0 = arith.constant 0 : i32
    %c0_i32_1 = arith.constant 0 : i32
    return %c0_i32, %c0_i32_0 : i32, i32
  }
  func.func @transform_3(%arg0: i32) -> (i32, i32) {
    %c0_i32 = arith.constant 0 : i32
    %c0_i32_0 = arith.constant 0 : i32
    %c0_i32_1 = arith.constant 0 : i32
    return %c0_i32, %c0_i32_0 : i32, i32
  }
  func.func @transform_4(%arg0: i32) -> (i32, i32) {
    %c0_i32 = arith.constant 0 : i32
    %c0_i32_0 = arith.constant 0 : i32
    %c0_i32_1 = arith.constant 0 : i32
    return %c0_i32, %c0_i32_0 : i32, i32
  }
  func.func @transform_5(%arg0: i32) -> (i32, i32) {
    %c0_i32 = arith.constant 0 : i32
    %c0_i32_0 = arith.constant 0 : i32
    %c0_i32_1 = arith.constant 0 : i32
    return %c0_i32, %c0_i32_0 : i32, i32
  }
  func.func @transform_6(%arg0: i32) -> (i32, i32) {
    %c0_i32 = arith.constant 0 : i32
    %c0_i32_0 = arith.constant 0 : i32
    %c0_i32_1 = arith.constant 0 : i32
    return %c0_i32, %c0_i32_0 : i32, i32
  }
  func.func @transform_7(%arg0: i32) -> (i32, i32) {
    %c0_i32 = arith.constant 0 : i32
    %c0_i32_0 = arith.constant 0 : i32
    %c0_i32_1 = arith.constant 0 : i32
    return %c0_i32, %c0_i32_0 : i32, i32
  }
  func.func @transform_8(%arg0: i32) -> (i32, i32) {
    %c0_i32 = arith.constant 0 : i32
    %c0_i32_0 = arith.constant 0 : i32
    %c0_i32_1 = arith.constant 0 : i32
    return %c0_i32, %c0_i32_0 : i32, i32
  }
  func.func @transform_9(%arg0: i32) -> (i32, i32) {
    %c0_i32 = arith.constant 0 : i32
    %c0_i32_0 = arith.constant 0 : i32
    %c0_i32_1 = arith.constant 0 : i32
    return %c0_i32, %c0_i32_0 : i32, i32
  }
  func.func @transform_10(%arg0: i32) -> (i32, i32) {
    %c0_i32 = arith.constant 0 : i32
    %c0_i32_0 = arith.constant 0 : i32
    %c0_i32_1 = arith.constant 0 : i32
    return %c0_i32, %c0_i32_0 : i32, i32
  }
  func.func @transform_11(%arg0: i32) -> (i32, i32) {
    %c0_i32 = arith.constant 0 : i32
    %c0_i32_0 = arith.constant 0 : i32
    %c0_i32_1 = arith.constant 0 : i32
    return %c0_i32, %c0_i32_0 : i32, i32
  }
  func.func @transform_12(%arg0: i32) -> (i32, i32) {
    %c0_i32 = arith.constant 0 : i32
    %c0_i32_0 = arith.constant 0 : i32
    return %arg0, %c0_i32 : i32, i32
  }
}

</mosaic_0001>

<bundles_post_ra>
// kernel: decoder_rnn_forward.1
= control target key start
LH: loop header
LB: loop body
LE: loop exit
PB: predicated region body
PF: predicated region fallthrough
CT: control target
= control target key end

     0   :  { %s3634_s21 = smov 0   ;;  %s4993_s0 = inlined_call_operand.vmem [shape: bf16[128,128], index: 0, kind: input, shape index: {}]   ;;  %s4994_s1 = inlined_call_operand.vmem [shape: f32[16,256], index: 1, kind: input, shape index: {}]   ;;  %s4995_s2 = inlined_call_operand.vmem [shape: bf16[128,512], index: 2, kind: input, shape index: {}]   ;;  %s4996_s3 = inlined_call_operand.vmem [shape: bf16[256,512], index: 3, kind: input, shape index: {}]   ;;  %s4997_s4 = inlined_call_operand.vmem [shape: f32[1,512], index: 4, kind: input, shape index: {}]   ;;  %s4998_s5 = inlined_call_operand.vmem [shape: bf16[128,512], index: 5, kind: input, shape index: {}]   ;;  %s4999_s6 = inlined_call_operand.vmem [shape: bf16[128,256], index: 6, kind: input, shape index: {}]   ;;  %s5000_s7 = inlined_call_operand.vmem [shape: f32[1,256], index: 7, kind: input, shape index: {}]   ;;  %s5001_s8 = inlined_call_operand.vmem [shape: f32[256,128], index: 8, kind: input, shape index: {}]   ;;  %s5002_s9 = inlined_call_operand.vmem [shape: f32[1,128], index: 9, kind: input, shape index: {}]   ;;  %s5003_s10 = inlined_call_operand.vmem [shape: f32[256,128], index: 10, kind: input, shape index: {}]   ;;  %s5004_s11 = inlined_call_operand.vmem [shape: f32[1,128], index: 11, kind: input, shape index: {}]   ;;  %s5005_s12 = inlined_call_operand.vmem [shape: f32[128,256], index: 12, kind: output, shape index: {}]  }
   0x1 LB: > { %s3640_s22 = sadd.s32 4294967295, %s3566_s21   ;;  %p2923_p0 = scmp.ge.s32.totalorder %s3566_s21, 1  ;;  %s3566_s21 = sphi %s3634_s21, %s22_s21  }
   0x2   : > { %p373_p1 = scmp.lt.s32.totalorder %s3566_s21, 3 }
   0x4   : > { %p374_p2 = pnand %p2923_p0, %p373_p1 }
   0x6   : > { %377 = sbr.rel (%p374_p2) target bundleno = 2493 (0x9bd), region = 68 }
   0xd   : > { %v458_v0 = vld [vmem:[%s5001_s8 + $0x80] sm:$0xff]  ;;  %v459_v1 = vld [vmem:[%s5001_s8 + $0x88] sm:$0xff]  ;;  %p427_p3 = scmp.lt.s32.totalorder %s3640_s22, 1  ;;  %v460_v5 = vld [vmem:[%s5001_s8 + $0x90] sm:$0xff]  ;;  %s2924_s13 = sshll.u32 %s3640_s22, 3 }
   0xe   : > { %v442_v2 = vld [vmem:[%s5001_s8] sm:$0xff]  ;;  %v3155_v3 = vpack.c.bf16 %v459_v1, %v458_v0  ;;  %v443_v4 = vld [vmem:[%s5001_s8 + $0x8] sm:$0xff]  ;;  %v461_v6 = vld [vmem:[%s5001_s8 + $0x98] sm:$0xff]  ;;  %p422_p4 = scmp.lt.s32.totalorder %s2924_s13, 15 }
   0xf   : > { %v3157_v7 = vpack.c.bf16 %v443_v4, %v442_v2  ;;  %v3159_v8 = vpack.c.bf16 %v461_v6, %v460_v5  ;;  %v444_v9 = vld [vmem:[%s5001_s8 + $0x10] sm:$0xff]  ;;  %v445_v10 = vld [vmem:[%s5001_s8 + $0x18] sm:$0xff]  ;;  %v462_v11 = vld [vmem:[%s5001_s8 + $0xa0] sm:$0xff]  ;;  %s428_s25 = scalar_select %p427_p3, %s3640_s22, 1 }
  0x10   : > { %3156 = vmatprep.subr.bf16.mxu1 %v3155_v3  ;;  %v463_v12 = vld [vmem:[%s5001_s8 + $0xa8] sm:$0xff]  ;;  %v3161_v13 = vpack.c.bf16 %v445_v10, %v444_v9  ;;  %v446_v15 = vld [vmem:[%s5001_s8 + $0x20] sm:$0xff]  ;;  %v464_v17 = vld [vmem:[%s5001_s8 + $0xb0] sm:$0xff]  ;;  %s5056_s13 = smov (!%p422_p4, %s2924_s13), 15 }
  0x11   : > { %3158 = vmatpush3.bf16.msra.mxu1 %v3157_v7  ;;  %s3083_s28 = sshll.u32 %s428_s25, 4  ;;  %v3163_v14 = vpack.c.bf16 %v463_v12, %v462_v11  ;;  %v447_v16 = vld [vmem:[%s5001_s8 + $0x28] sm:$0xff]  ;;  %v465_v18 = vld [vmem:[%s5001_s8 + $0xb8] sm:$0xff]  ;;  %v448_v21 = vld [vmem:[%s5001_s8 + $0x30] sm:$0xff]  ;;  %s2925_s16 = sshll.u32 %s5056_s13, 2 }
  0x12   : > { %3160 = vmatprep.subr.bf16.mxu1 %v3159_v8  ;;  %s3691_s23 = scalar_lea.vmem %s4994_s1, %s3083_s28  ;;  %v3165_v19 = vpack.c.bf16 %v447_v16, %v446_v15  ;;  %v3167_v20 = vpack.c.bf16 %v465_v18, %v464_v17  ;;  %v449_v22 = vld [vmem:[%s5001_s8 + $0x38] sm:$0xff]  ;;  %v466_v23 = vld [vmem:[%s5001_s8 + $0xc0] sm:$0xff]  ;;  %v467_v24 = vld [vmem:[%s5001_s8 + $0xc8] sm:$0xff]  ;;  %s3998_s27 = scalar_lea.vmem %s4993_s0, %s2925_s16 }
  0x13   : > { %v3706_v25 = vld [vmem:[%s3691_s23 + $0x8] sm:$0xff]  ;;  %v3169_v27 = vpack.c.bf16 %v449_v22, %v448_v21  ;;  %v3171_v28 = vpack.c.bf16 %v467_v24, %v466_v23  ;;  %v450_v29 = vld [vmem:[%s5001_s8 + $0x40] sm:$0xff]  ;;  %v468_v31 = vld [vmem:[%s5001_s8 + $0xd0] sm:$0xff]  ;;  %s3084_s17 = sshll.u32 %s5056_s13, 4 }
  0x14   : > { %545 = vmatprep.mubr.f32.mxu1 %v3706_v25  ;;  %v3711_v26 = vpack.c.bf16 %v3706_v25, %v3706_v25  ;;  %v451_v30 = vld [vmem:[%s5001_s8 + $0x48] sm:$0xff]  ;;  %v469_v32 = vld [vmem:[%s5001_s8 + $0xd8] sm:$0xff]  ;;  %v452_v35 = vld [vmem:[%s5001_s8 + $0x50] sm:$0xff]  ;;  %s4971_s22 = scalar_lea.vmem %s5005_s12, %s3084_s17 }
  0x15   : > { %3162 = vmatpush3.bf16.msra.mxu1 %v3161_v13  ;;  %v3173_v33 = vpack.c.bf16 %v451_v30, %v450_v29  ;;  %v3175_v34 = vpack.c.bf16 %v469_v32, %v468_v31  ;;  %v453_v36 = vld [vmem:[%s5001_s8 + $0x58] sm:$0xff]  ;;  %v470_v37 = vld [vmem:[%s5001_s8 + $0xe0] sm:$0xff]  ;;  %v471_v38 = vld [vmem:[%s5001_s8 + $0xe8] sm:$0xff] }
  0x16   : > { %3164 = vmatprep.subr.bf16.mxu1 %v3163_v14  ;;  %1100 = vmatprep.mubr.bf16.mxu0 %v3711_v26  ;;  %v3177_v39 = vpack.c.bf16 %v453_v36, %v452_v35  ;;  %v454_v40 = vld [vmem:[%s5001_s8 + $0x60] sm:$0xff]  ;;  %v455_v41 = vld [vmem:[%s5001_s8 + $0x68] sm:$0xff]  ;;  %v3179_v42 = vpack.c.bf16 %v471_v38, %v470_v37  ;;  %v472_v45 = vld [vmem:[%s5001_s8 + $0xf0] sm:$0xff] }
  0x17   : > { %v3228_v43 = vld [vmem:[%s4996_s3 + $0x4] ss:$16 sps:$4 sm:$0xff]   ;;  %v3230_v44 = vld [vmem:[%s4996_s3] ss:$16 sps:$4 sm:$0xff]   ;;  %v473_v46 = vld [vmem:[%s5001_s8 + $0xf8] sm:$0xff]  ;;  %v3181_v49 = vpack.c.bf16 %v455_v41, %v454_v40 }
  0x18   : > { %v456_v47 = vld [vmem:[%s5001_s8 + $0x70] sm:$0xff]  ;;  %v457_v48 = vld [vmem:[%s5001_s8 + $0x78] sm:$0xff]  ;;  %1068 = vmatprep.subr.bf16.mxu0 %v3228_v43  ;;  %v3183_v52 = vpack.c.bf16 %v473_v46, %v472_v45  ;;  %v567_v53 = vld [vmem:[%s5003_s10 + $0x80] sm:$0xff] }
  0x19   : > { %3166 = vmatpush3.bf16.msra.mxu1 %v3165_v19  ;;  %1069 = vmatpush1.bf16.msra.mxu0 %v3230_v44  ;;  %v3231_v50 = vld [vmem:[%s4996_s3 + $0x24] ss:$16 sps:$4 sm:$0xff]   ;;  %v3233_v51 = vld [vmem:[%s4996_s3 + $0x20] ss:$16 sps:$4 sm:$0xff]   ;;  %v568_v54 = vld [vmem:[%s5003_s10 + $0x88] sm:$0xff]  ;;  %v3185_v57 = vpack.c.bf16 %v457_v48, %v456_v47 }
  0x1a   : > { %3168 = vmatprep.subr.bf16.mxu1 %v3167_v20  ;;  %1070 = vmatprep.subr.bf16.mxu0 %v3231_v50  ;;  %v3237_v55 = vld [vmem:[%s4996_s3 + $0x44] ss:$16 sps:$4 sm:$0xff]   ;;  %v552_v58 = vld [vmem:[%s5003_s10 + $0x8] sm:$0xff]  ;;  %v3239_v59 = vld [vmem:[%s4996_s3 + $0x40] ss:$16 sps:$4 sm:$0xff]   ;;  %v3187_v60 = vpack.c.bf16 %v568_v54, %v567_v53 }
  0x1b   : > { %v551_v56 = vld [vmem:[%s5003_s10] sm:$0xff]  ;;  %v569_v61 = vld [vmem:[%s5003_s10 + $0x90] sm:$0xff]  ;;  %v570_v0 = vld [vmem:[%s5003_s10 + $0x98] sm:$0xff] }
  0x1c   : > { %v3243_v62 = vld [vmem:[%s4996_s3 + $0x64] ss:$16 sps:$4 sm:$0xff]   ;;  %v3189_v2 = vpack.c.bf16 %v552_v58, %v551_v56  ;;  %v554_v3 = vld [vmem:[%s5003_s10 + $0x18] sm:$0xff]  ;;  %v3191_v5 = vpack.c.bf16 %v570_v0, %v569_v61  ;;  %v572_v6 = vld [vmem:[%s5003_s10 + $0xa8] sm:$0xff] }
  0x1d   : > { %3170 = vmatpush3.bf16.msra.mxu1 %v3169_v27  ;;  %1071 = vmatpush1.bf16.msra.mxu0 %v3233_v51  ;;  %v3793_v63 = vld [vmem:[%s3691_s23] sm:$0xff]  ;;  %v553_v1 = vld [vmem:[%s5003_s10 + $0x10] sm:$0xff]  ;;  %v556_v11 = vld [vmem:[%s5003_s10 + $0x28] sm:$0xff] }
  0x1e   : > { %3172 = vmatprep.subr.bf16.mxu1 %v3171_v28  ;;  %1072 = vmatprep.subr.bf16.mxu0 %v3237_v55  ;;  %v571_v4 = vld [vmem:[%s5003_s10 + $0xa0] sm:$0xff]  ;;  %v3193_v10 = vpack.c.bf16 %v554_v3, %v553_v1  ;;  %v573_v12 = vld [vmem:[%s5003_s10 + $0xb0] sm:$0xff]  ;;  %v574_v14 = vld [vmem:[%s5003_s10 + $0xb8] sm:$0xff] }
  0x1f   : > { %v3245_v7 = vld [vmem:[%s4996_s3 + $0x60] ss:$16 sps:$4 sm:$0xff]   ;;  %v3249_v8 = vld [vmem:[%s4996_s3 + $0x84] ss:$16 sps:$4 sm:$0xff]   ;;  %v3195_v13 = vpack.c.bf16 %v572_v6, %v571_v4  ;;  %v558_v19 = vld [vmem:[%s5003_s10 + $0x38] sm:$0xff]  ;;  %v3199_v21 = vpack.c.bf16 %v574_v14, %v573_v12 }
  0x20   : > { %v555_v9 = vld [vmem:[%s5003_s10 + $0x20] sm:$0xff]  ;;  %v557_v17 = vld [vmem:[%s5003_s10 + $0x30] sm:$0xff]  ;;  %v576_v22 = vld [vmem:[%s5003_s10 + $0xc8] sm:$0xff] }
  0x21   : > { %3174 = vmatpush3.bf16.msra.mxu1 %v3173_v33  ;;  %1073 = vmatpush1.bf16.msra.mxu0 %v3239_v59  ;;  %v3251_v15 = vld [vmem:[%s4996_s3 + $0x80] ss:$16 sps:$4 sm:$0xff]   ;;  %v3255_v16 = vld [vmem:[%s4996_s3 + $0xa4] ss:$16 sps:$4 sm:$0xff]   ;;  %v3197_v18 = vpack.c.bf16 %v556_v11, %v555_v9  ;;  %v3201_v27 = vpack.c.bf16 %v558_v19, %v557_v17  ;;  %v560_v28 = vld [vmem:[%s5003_s10 + $0x48] sm:$0xff] }
  0x22   : > { %3176 = vmatprep.subr.bf16.mxu1 %v3175_v34  ;;  %1074 = vmatprep.subr.bf16.mxu0 %v3243_v62  ;;  %v575_v20 = vld [vmem:[%s5003_s10 + $0xc0] sm:$0xff]  ;;  %v577_v29 = vld [vmem:[%s5003_s10 + $0xd0] sm:$0xff]  ;;  %v578_v31 = vld [vmem:[%s5003_s10 + $0xd8] sm:$0xff] }
  0x23   : > { %v3257_v23 = vld [vmem:[%s4996_s3 + $0xa0] ss:$16 sps:$4 sm:$0xff]   ;;  %v3261_v24 = vld [vmem:[%s4996_s3 + $0xc4] ss:$16 sps:$4 sm:$0xff]   ;;  %v3203_v30 = vpack.c.bf16 %v576_v22, %v575_v20  ;;  %v562_v36 = vld [vmem:[%s5003_s10 + $0x58] sm:$0xff]  ;;  %v3207_v38 = vpack.c.bf16 %v578_v31, %v577_v29 }
  0x24   : > { %v3263_v32 = vld [vmem:[%s4996_s3 + $0xc0] ss:$16 sps:$4 sm:$0xff]   ;;  %v3267_v33 = vld [vmem:[%s4996_s3 + $0xe4] ss:$16 sps:$4 sm:$0xff]   ;;  %v564_v44 = vld [vmem:[%s5003_s10 + $0x68] sm:$0xff] }
  0x25   : > { %3178 = vmatpush3.bf16.msra.mxu1 %v3177_v39  ;;  %1075 = vmatpush1.bf16.msra.mxu0 %v3245_v7  ;;  %v561_v34 = vld [vmem:[%s5003_s10 + $0x50] sm:$0xff]  ;;  %v579_v37 = vld [vmem:[%s5003_s10 + $0xe0] sm:$0xff]  ;;  %v580_v39 = vld [vmem:[%s5003_s10 + $0xe8] sm:$0xff] }
  0x26   : > { %3180 = vmatprep.subr.bf16.mxu1 %v3179_v42  ;;  %1076 = vmatprep.subr.bf16.mxu0 %v3249_v8  ;;  %v3269_v40 = vld [vmem:[%s4996_s3 + $0xe0] ss:$16 sps:$4 sm:$0xff]   ;;  %v3273_v41 = vld [vmem:[%s4996_s3 + $0x104] ss:$16 sps:$4 sm:$0xff]   ;;  %v3209_v43 = vpack.c.bf16 %v562_v36, %v561_v34  ;;  %v3211_v46 = vpack.c.bf16 %v580_v39, %v579_v37  ;;  %v582_v47 = vld [vmem:[%s5003_s10 + $0xf8] sm:$0xff] }
  0x27   : > { %v563_v42 = vld [vmem:[%s5003_s10 + $0x60] sm:$0xff]  ;;  %v581_v45 = vld [vmem:[%s5003_s10 + $0xf0] sm:$0xff]  ;;  %v566_v53 = vld [vmem:[%s5003_s10 + $0x78] sm:$0xff] }
  0x28   : > { %v3275_v48 = vld [vmem:[%s4996_s3 + $0x100] ss:$16 sps:$4 sm:$0xff]   ;;  %v3213_v50 = vpack.c.bf16 %v564_v44, %v563_v42  ;;  %v3285_v55 = vld [vmem:[%s4996_s3 + $0x144] ss:$16 sps:$4 sm:$0xff]   ;;  %v3242_v61 = vld [vmem:[%s4996_s3 + $0x2c] ss:$16 sps:$4 sm:$0xff]  }
  0x29   : > { %3182 = vmatpush3.bf16.msra.mxu1 %v3181_v49  ;;  %1077 = vmatpush1.bf16.msra.mxu0 %v3251_v15  ;;  %v3279_v49 = vld [vmem:[%s4996_s3 + $0x124] ss:$16 sps:$4 sm:$0xff]   ;;  %v3281_v54 = vld [vmem:[%s4996_s3 + $0x120] ss:$16 sps:$4 sm:$0xff]   ;;  %v3240_v1 = vld [vmem:[%s4996_s3 + $0x28] ss:$16 sps:$4 sm:$0xff]  }
  0x2a   : > { %3184 = vmatprep.subr.bf16.mxu1 %v3183_v52  ;;  %1078 = vmatprep.subr.bf16.mxu0 %v3255_v16  ;;  %v565_v51 = vld [vmem:[%s5003_s10 + $0x70] sm:$0xff]  ;;  %v3215_v52 = vpack.c.bf16 %v582_v47, %v581_v45  ;;  %v3252_v8 = vld [vmem:[%s4996_s3 + $0x68] ss:$16 sps:$4 sm:$0xff]   ;;  %v3260_v9 = vld [vmem:[%s4996_s3 + $0x8c] ss:$16 sps:$4 sm:$0xff]  }
  0x2b   : > { %v3217_v56 = vpack.c.bf16 %v566_v53, %v565_v51  ;;  %v3287_v58 = vld [vmem:[%s4996_s3 + $0x140] ss:$16 sps:$4 sm:$0xff]   ;;  %v3291_v59 = vld [vmem:[%s4996_s3 + $0x164] ss:$16 sps:$4 sm:$0xff]   ;;  %v3258_v12 = vld [vmem:[%s4996_s3 + $0x88] ss:$16 sps:$4 sm:$0xff]  }
  0x2c   : > { %v3293_v62 = vld [vmem:[%s4996_s3 + $0x160] ss:$16 sps:$4 sm:$0xff]   ;;  %v3297_v0 = vld [vmem:[%s4996_s3 + $0x184] ss:$16 sps:$4 sm:$0xff]   ;;  %v3264_v16 = vld [vmem:[%s4996_s3 + $0xa8] ss:$16 sps:$4 sm:$0xff]  }
  0x2d   : > { %3186 = vmatpush3.bf16.msra.mxu1 %v3185_v57  ;;  %1079 = vmatpush1.bf16.msra.mxu0 %v3257_v23  ;;  %v3236_v57 = vld [vmem:[%s4996_s3 + $0xc] ss:$16 sps:$4 sm:$0xff]   ;;  %v3299_v3 = vld [vmem:[%s4996_s3 + $0x180] ss:$16 sps:$4 sm:$0xff]   ;;  %v3303_v4 = vld [vmem:[%s4996_s3 + $0x1a4] ss:$16 sps:$4 sm:$0xff]  }
  0x2e   : > { %3188 = vmatprep.subr.bf16.mxu1 %v3187_v60  ;;  %1080 = vmatprep.subr.bf16.mxu0 %v3261_v24  ;;  %v3234_v60 = vld [vmem:[%s4996_s3 + $0x8] ss:$16 sps:$4 sm:$0xff]   ;;  %v3305_v6 = vld [vmem:[%s4996_s3 + $0x1a0] ss:$16 sps:$4 sm:$0xff]   ;;  %v3309_v7 = vld [vmem:[%s4996_s3 + $0x1c4] ss:$16 sps:$4 sm:$0xff]  }
  0x2f   : > { %v3315_v11 = vld [vmem:[%s4996_s3 + $0x1e4] ss:$16 sps:$4 sm:$0xff]   ;;  %v3317_v14 = vld [vmem:[%s4996_s3 + $0x1e0] ss:$16 sps:$4 sm:$0xff]   ;;  %v3272_v17 = vld [vmem:[%s4996_s3 + $0xcc] ss:$16 sps:$4 sm:$0xff]  }
  0x30   : > { %546 = vmatmul.mubr.f32.vlgmr.msra.gmra.mrb[0].mxu1 %v3793_v63  ;;  %v3323_v15 = vld [vmem:[%s4995_s2 + $0x4] ss:$16 sps:$4 sm:$0xff]   ;;  %v3321_v19 = vld [vmem:[%s4995_s2] ss:$16 sps:$4 sm:$0xff]   ;;  %v5008_v24 = vmov 0  }
  0x31   : > { %3190 = vmatpush3.bf16.msra.mxu1 %v3189_v2  ;;  %654 = vmatprep.mubr.f32.mxu1 %v3706_v25  ;;  %v559_v25 = vld [vmem:[%s5003_s10 + $0x40] sm:$0xff]  ;;  %v3248_v2 = vld [vmem:[%s4996_s3 + $0x4c] ss:$16 sps:$4 sm:$0xff]   ;;  %v3288_v34 = vld [vmem:[%s4996_s3 + $0x128] ss:$16 sps:$4 sm:$0xff]  }
  0x32   : > { %3192 = vmatprep.subr.bf16.mxu1 %v3191_v5  ;;  %v3205_v35 = vpack.c.bf16 %v560_v28, %v559_v25  ;;  %1081 = vmatpush1.bf16.msra.mxu0 %v3263_v32  ;;  %v3254_v5 = vld [vmem:[%s4996_s3 + $0x6c] ss:$16 sps:$4 sm:$0xff]   ;;  %v3329_v20 = vld [vmem:[%s4995_s2 + $0x24] ss:$16 sps:$4 sm:$0xff]   ;;  %v3327_v22 = vld [vmem:[%s4995_s2 + $0x20] ss:$16 sps:$4 sm:$0xff]  }
  0x33   : > { %1082 = vmatprep.subr.bf16.mxu0 %v3267_v33  ;;  %v3335_v23 = vld [vmem:[%s4995_s2 + $0x44] ss:$16 sps:$4 sm:$0xff]   ;;  %v3276_v25 = vld [vmem:[%s4996_s3 + $0xe8] ss:$16 sps:$4 sm:$0xff]   ;;  %v3333_v28 = vld [vmem:[%s4995_s2 + $0x40] ss:$16 sps:$4 sm:$0xff]  }
  0x34   : > { %v3341_v29 = vld [vmem:[%s4995_s2 + $0x64] ss:$16 sps:$4 sm:$0xff]   ;;  %v3290_v31 = vld [vmem:[%s4996_s3 + $0x12c] ss:$16 sps:$4 sm:$0xff]   ;;  %v3339_v32 = vld [vmem:[%s4995_s2 + $0x60] ss:$16 sps:$4 sm:$0xff]  }
  0x35   : > { %3194 = vmatpush3.bf16.msra.mxu1 %v3193_v10  ;;  %v3311_v10 = vld [vmem:[%s4996_s3 + $0x1c0] ss:$16 sps:$4 sm:$0xff]   ;;  %v3347_v33 = vld [vmem:[%s4995_s2 + $0x84] ss:$16 sps:$4 sm:$0xff]   ;;  %v3302_v39 = vld [vmem:[%s4996_s3 + $0x16c] ss:$16 sps:$4 sm:$0xff]  }
  0x36   : > { %3196 = vmatprep.subr.bf16.mxu1 %v3195_v13  ;;  %1083 = vmatpush1.bf16.msra.mxu0 %v3269_v40  ;;  %v3266_v13 = vld [vmem:[%s4996_s3 + $0xac] ss:$16 sps:$4 sm:$0xff]   ;;  %v3345_v36 = vld [vmem:[%s4995_s2 + $0x80] ss:$16 sps:$4 sm:$0xff]   ;;  %v3353_v37 = vld [vmem:[%s4995_s2 + $0xa4] ss:$16 sps:$4 sm:$0xff]  }
  0x37   : > { %1084 = vmatprep.subr.bf16.mxu0 %v3273_v41  ;;  %v3351_v40 = vld [vmem:[%s4995_s2 + $0xa0] ss:$16 sps:$4 sm:$0xff]   ;;  %v3300_v41 = vld [vmem:[%s4996_s3 + $0x168] ss:$16 sps:$4 sm:$0xff]   ;;  %v3359_v42 = vld [vmem:[%s4995_s2 + $0xc4] ss:$16 sps:$4 sm:$0xff]  }
  0x38   : > { %v3357_v44 = vld [vmem:[%s4995_s2 + $0xc0] ss:$16 sps:$4 sm:$0xff]   ;;  %v3365_v45 = vld [vmem:[%s4995_s2 + $0xe4] ss:$16 sps:$4 sm:$0xff]   ;;  %v3314_v47 = vld [vmem:[%s4996_s3 + $0x1ac] ss:$16 sps:$4 sm:$0xff]  }
  0x39   : > { %3198 = vmatpush3.bf16.msra.mxu1 %v3197_v18  ;;  %v4008_v18 = vpack.c.bf16 %v3793_v63, %v3793_v63  ;;  %v4108_v51 = vld [vmem:[%s3998_s27] sm:$0xff]  }
  0x3a   : > { %3200 = vmatprep.subr.bf16.mxu1 %v3199_v21  ;;  %1085 = vmatpush1.bf16.msra.mxu0 %v3275_v48  ;;  %v3270_v21 = vld [vmem:[%s4996_s3 + $0xc8] ss:$16 sps:$4 sm:$0xff]   ;;  %v3363_v48 = vld [vmem:[%s4995_s2 + $0xe0] ss:$16 sps:$4 sm:$0xff]  }
  0x3b   : > { %1086 = vmatprep.subr.bf16.mxu0 %v3279_v49  ;;  %v4102_v49 = vld [vmem:[%s4998_s5 + $0x4] ss:$16 sps:$4 sm:$0xff]   ;;  %v4117_v53 = vld [vmem:[%s4998_s5] ss:$16 sps:$4 sm:$0xff]  }
  0x3d   : > { %3202 = vmatpush3.bf16.msra.mxu1 %v3201_v27  ;;  %v3284_v27 = vld [vmem:[%s4996_s3 + $0x10c] ss:$16 sps:$4 sm:$0xff]  }
  0x3e   : > { %3204 = vmatprep.subr.bf16.mxu1 %v3203_v30  ;;  %1087 = vmatpush1.bf16.msra.mxu0 %v3281_v54  ;;  %v3282_v30 = vld [vmem:[%s4996_s3 + $0x108] ss:$16 sps:$4 sm:$0xff]   ;;  %v4122_v54 = vld [vmem:[%s4998_s5 + $0x24] ss:$16 sps:$4 sm:$0xff]  }
  0x3f   : > { %1088 = vmatprep.subr.bf16.mxu0 %v3285_v55  ;;  %v3318_v55 = vld [vmem:[%s4996_s3 + $0x1c8] ss:$16 sps:$4 sm:$0xff]  }
  0x41   : > { %3206 = vmatpush3.bf16.msra.mxu1 %v3205_v35  ;;  %v3296_v35 = vld [vmem:[%s4996_s3 + $0x14c] ss:$16 sps:$4 sm:$0xff]  }
  0x42   : > { %3208 = vmatprep.subr.bf16.mxu1 %v3207_v38  ;;  %1089 = vmatpush1.bf16.msra.mxu0 %v3287_v58  ;;  %v3294_v38 = vld [vmem:[%s4996_s3 + $0x148] ss:$16 sps:$4 sm:$0xff]   ;;  %v4142_v58 = vld [vmem:[%s4998_s5 + $0x44] ss:$16 sps:$4 sm:$0xff]  }
  0x43   : > { %1090 = vmatprep.subr.bf16.mxu0 %v3291_v59  ;;  %v3324_v59 = vld [vmem:[%s4996_s3 + $0x1e8] ss:$16 sps:$4 sm:$0xff]  }
  0x45   : > { %3210 = vmatpush3.bf16.msra.mxu1 %v3209_v43  ;;  %v3308_v43 = vld [vmem:[%s4996_s3 + $0x18c] ss:$16 sps:$4 sm:$0xff]  }
  0x46   : > { %3212 = vmatprep.subr.bf16.mxu1 %v3211_v46  ;;  %1091 = vmatpush1.bf16.msra.mxu0 %v3293_v62  ;;  %v3306_v46 = vld [vmem:[%s4996_s3 + $0x188] ss:$16 sps:$4 sm:$0xff]   ;;  %v4157_v62 = vld [vmem:[%s4998_s5 + $0x40] ss:$16 sps:$4 sm:$0xff]  }
  0x47   : > { %1092 = vmatprep.subr.bf16.mxu0 %v3297_v0  ;;  %v4163_v0 = vld [vmem:[%s4998_s5 + $0x64] ss:$16 sps:$4 sm:$0xff]  }
  0x49   : > { %3214 = vmatpush3.bf16.msra.mxu1 %v3213_v50  ;;  %v3312_v50 = vld [vmem:[%s4996_s3 + $0x1a8] ss:$16 sps:$4 sm:$0xff]  }
  0x4a   : > { %3216 = vmatprep.subr.bf16.mxu1 %v3215_v52  ;;  %1093 = vmatpush1.bf16.msra.mxu0 %v3299_v3  ;;  %v3320_v52 = vld [vmem:[%s4996_s3 + $0x1cc] ss:$16 sps:$4 sm:$0xff]   ;;  %v4177_v3 = vld [vmem:[%s4998_s5 + $0x60] ss:$16 sps:$4 sm:$0xff]  }
  0x4b   : > { %1094 = vmatprep.subr.bf16.mxu0 %v3303_v4  ;;  %v4184_v4 = vld [vmem:[%s4998_s5 + $0x84] ss:$16 sps:$4 sm:$0xff]  }
  0x4d   : > { %3218 = vmatpush3.bf16.msra.mxu1 %v3217_v56  ;;  %v3326_v56 = vld [vmem:[%s4996_s3 + $0x1ec] ss:$16 sps:$4 sm:$0xff]  }
  0x4e   : > { %1109 = vmatprep.subr.bf16.mxu1 %v3236_v57  ;;  %1095 = vmatpush1.bf16.msra.mxu0 %v3305_v6  ;;  %v4136_v57 = vld [vmem:[%s4998_s5 + $0x20] ss:$16 sps:$4 sm:$0xff]   ;;  %v3344_v6 = vld [vmem:[%s4995_s2 + $0x4c] ss:$16 sps:$4 sm:$0xff]  }
  0x4f   : > { %1096 = vmatprep.subr.bf16.mxu0 %v3309_v7  ;;  %v4200_v7 = vld [vmem:[%s4998_s5 + $0x80] ss:$16 sps:$4 sm:$0xff]  }
  0x50   : > { %655 = vmatmul.mubr.f32.vlgmr.msra.gmra.mrb[2].mxu1 %v3793_v63  ;;  %v3278_v63 = vld [vmem:[%s4996_s3 + $0xec] ss:$16 sps:$4 sm:$0xff]  }
  0x51   : > { %1110 = vmatpush1.bf16.msra.mxu1 %v3234_v60  ;;  %1141 = vmatprep.mubr.bf16.mxu1 %v3711_v26  ;;  %v3246_v26 = vld [vmem:[%s4996_s3 + $0x48] ss:$16 sps:$4 sm:$0xff]  }
  0x52   : > { %1111 = vmatprep.subr.bf16.mxu1 %v3242_v61  ;;  %1097 = vmatpush1.bf16.msra.mxu0 %v3311_v10  ;;  %v4148_v60 = vld [vmem:[%s3998_s27 + $0x8] sm:$0xff]  }
  0x53   : > { %1098 = vmatprep.subr.bf16.mxu0 %v3315_v11  ;;  %v3332_v61 = vld [vmem:[%s4995_s2 + $0xc] ss:$16 sps:$4 sm:$0xff]   ;;  %v4220_v11 = vld [vmem:[%s4998_s5 + $0xa0] ss:$16 sps:$4 sm:$0xff]  }
  0x54   : > { %v3350_v10 = vld [vmem:[%s4995_s2 + $0x6c] ss:$16 sps:$4 sm:$0xff]  }
  0x55   : > { %1112 = vmatpush1.bf16.msra.mxu1 %v3240_v1  ;;  %v3330_v1 = vld [vmem:[%s4995_s2 + $0x8] ss:$16 sps:$4 sm:$0xff]  }
  0x56   : > { %1113 = vmatprep.subr.bf16.mxu1 %v3248_v2  ;;  %1099 = vmatpush1.bf16.msra.mxu0 %v3317_v14  ;;  %v3338_v2 = vld [vmem:[%s4995_s2 + $0x2c] ss:$16 sps:$4 sm:$0xff]  }
  0x57   : > { %1374 = vmatprep.subr.bf16.mxu0 %v3323_v15  ;;  %v4232_v14 = vld [vmem:[%s3998_s27 + $0x18] sm:$0xff]  }
  0x58   : > { %v3356_v15 = vld [vmem:[%s4995_s2 + $0x8c] ss:$16 sps:$4 sm:$0xff]  }
  0x59   : > { %1114 = vmatpush1.bf16.msra.mxu1 %v3246_v26  ;;  %1101 = vmatmul.mubr.bf16.vlgmr.msra.gmra.mrb[0].mxu0 %v4008_v18  ;;  %v3336_v26 = vld [vmem:[%s4995_s2 + $0x28] ss:$16 sps:$4 sm:$0xff]  }
  0x5a   : > { %1115 = vmatprep.subr.bf16.mxu1 %v3254_v5  ;;  %1375 = vmatpush1.bf16.msra.mxu0 %v3321_v19  ;;  %v4191_v5 = vld [vmem:[%s3998_s27 + $0x10] sm:$0xff]   ;;  %v3362_v19 = vld [vmem:[%s4995_s2 + $0xac] ss:$16 sps:$4 sm:$0xff]  }
  0x5b   : > { %1376 = vmatprep.subr.bf16.mxu0 %v3329_v20  ;;  %1406 = vmatprep.mubr.bf16.mxu0 %v5008_v24  ;;  %v4261_v20 = vld [vmem:[%s4998_s5 + $0xe0] ss:$16 sps:$4 sm:$0xff]  }
  0x5d   : > { %1116 = vmatpush1.bf16.msra.mxu1 %v3252_v8  ;;  %v4206_v8 = vld [vmem:[%s4998_s5 + $0xa4] ss:$16 sps:$4 sm:$0xff]  }
  0x5e   : > { %1117 = vmatprep.subr.bf16.mxu1 %v3260_v9  ;;  %1377 = vmatpush1.bf16.msra.mxu0 %v3327_v22  ;;  %v3342_v9 = vld [vmem:[%s4995_s2 + $0x48] ss:$16 sps:$4 sm:$0xff]  }
  0x5f   : > { %1378 = vmatprep.subr.bf16.mxu0 %v3335_v23  ;;  %v3366_v22 = vld [vmem:[%s4995_s2 + $0xc8] ss:$16 sps:$4 sm:$0xff]   ;;  %v3372_v23 = vld [vmem:[%s4995_s2 + $0xec] ss:$16 sps:$4 sm:$0xff]  }
  0x61   : > { %1118 = vmatpush1.bf16.msra.mxu1 %v3258_v12  ;;  %v4226_v12 = vld [vmem:[%s4998_s5 + $0xc4] ss:$16 sps:$4 sm:$0xff]  }
  0x62   : > { %1119 = vmatprep.subr.bf16.mxu1 %v3266_v13  ;;  %1379 = vmatpush1.bf16.msra.mxu0 %v3333_v28  ;;  %v3348_v13 = vld [vmem:[%s4995_s2 + $0x68] ss:$16 sps:$4 sm:$0xff]  }
  0x63   : > { %1380 = vmatprep.subr.bf16.mxu0 %v3341_v29  ;;  %v4289_v28 = vld [vmem:[%s4998_s5 + $0x8] ss:$16 sps:$4 sm:$0xff]   ;;  %v4295_v29 = vld [vmem:[%s4998_s5 + $0x2c] ss:$16 sps:$4 sm:$0xff]  }
  0x65   : > { %1120 = vmatpush1.bf16.msra.mxu1 %v3264_v16  ;;  %v4241_v16 = vld [vmem:[%s4998_s5 + $0xc0] ss:$16 sps:$4 sm:$0xff]  }
  0x66   : > { %1121 = vmatprep.subr.bf16.mxu1 %v3272_v17  ;;  %1381 = vmatpush1.bf16.msra.mxu0 %v3339_v32  ;;  %v4247_v17 = vld [vmem:[%s4998_s5 + $0xe4] ss:$16 sps:$4 sm:$0xff]   ;;  %v4315_v32 = vld [vmem:[%s4998_s5 + $0x48] ss:$16 sps:$4 sm:$0xff]  }
  0x67   : > { %1382 = vmatprep.subr.bf16.mxu0 %v3347_v33  ;;  %v4321_v33 = vld [vmem:[%s4998_s5 + $0x6c] ss:$16 sps:$4 sm:$0xff]  }
  0x69   : > { %1122 = vmatpush1.bf16.msra.mxu1 %v3270_v21  ;;  %v3360_v21 = vld [vmem:[%s4995_s2 + $0xa8] ss:$16 sps:$4 sm:$0xff]  }
  0x6a   : > { %1123 = vmatprep.subr.bf16.mxu1 %v3278_v63  ;;  %1383 = vmatpush1.bf16.msra.mxu0 %v3345_v36  ;;  %v3368_v63 = vld [vmem:[%s4995_s2 + $0xcc] ss:$16 sps:$4 sm:$0xff]   ;;  %v4341_v36 = vld [vmem:[%s4998_s5 + $0x88] ss:$16 sps:$4 sm:$0xff]  }
  0x6b   : > { %1384 = vmatprep.subr.bf16.mxu0 %v3353_v37  ;;  %v4347_v37 = vld [vmem:[%s4998_s5 + $0xac] ss:$16 sps:$4 sm:$0xff]  }
  0x6d   : > { %1124 = vmatpush1.bf16.msra.mxu1 %v3276_v25  ;;  %v3370_v25 = vld [vmem:[%s4995_s2 + $0xe8] ss:$16 sps:$4 sm:$0xff]  }
  0x6e   : > { %1125 = vmatprep.subr.bf16.mxu1 %v3284_v27  ;;  %1385 = vmatpush1.bf16.msra.mxu0 %v3351_v40  ;;  %v4284_v27 = vld [vmem:[%s4998_s5 + $0xc] ss:$16 sps:$4 sm:$0xff]   ;;  %v4367_v40 = vld [vmem:[%s4998_s5 + $0xc8] ss:$16 sps:$4 sm:$0xff]  }
  0x6f   : > { %1386 = vmatprep.subr.bf16.mxu0 %v3359_v42  ;;  %v4380_v42 = vld [vmem:[%s4998_s5 + $0xe8] ss:$16 sps:$4 sm:$0xff]  }
  0x71   : > { %1126 = vmatpush1.bf16.msra.mxu1 %v3282_v30  ;;  %v4303_v30 = vld [vmem:[%s4998_s5 + $0x28] ss:$16 sps:$4 sm:$0xff]  }
  0x72   : > { %1127 = vmatprep.subr.bf16.mxu1 %v3290_v31  ;;  %1387 = vmatpush1.bf16.msra.mxu0 %v3357_v44  ;;  %v4309_v31 = vld [vmem:[%s4998_s5 + $0x4c] ss:$16 sps:$4 sm:$0xff]   ;;  %v2931_v44 = vld [vmem:[%s5002_s9] ss:$0 sm:$0xff] }
  0x73   : > { %1388 = vmatprep.subr.bf16.mxu0 %v3365_v45 }
  0x75   : > { %1128 = vmatpush1.bf16.msra.mxu1 %v3288_v34  ;;  %v4329_v34 = vld [vmem:[%s4998_s5 + $0x68] ss:$16 sps:$4 sm:$0xff]  }
  0x76   : > { %1129 = vmatprep.subr.bf16.mxu1 %v3296_v35  ;;  %1389 = vmatpush1.bf16.msra.mxu0 %v3363_v48  ;;  %v4335_v35 = vld [vmem:[%s4998_s5 + $0x8c] ss:$16 sps:$4 sm:$0xff]  }
  0x77   : > { %1781 = vmatprep.subr.bf16.mxu0 %v4102_v49 }
  0x79   : > { %1130 = vmatpush1.bf16.msra.mxu1 %v3294_v38  ;;  %1407 = vmatmul.mubr.bf16.vlgmr.msra.gmra.mrb[4].mxu0 %v4108_v51  ;;  %v4355_v38 = vld [vmem:[%s4998_s5 + $0xa8] ss:$16 sps:$4 sm:$0xff]  }
  0x7a   : > { %1131 = vmatprep.subr.bf16.mxu1 %v3302_v39  ;;  %1416 = vmatprep.mubr.bf16.mxu0 %v5008_v24  ;;  %v4361_v39 = vld [vmem:[%s4998_s5 + $0xcc] ss:$16 sps:$4 sm:$0xff]  }
  0x7b   : > { %1782 = vmatpush1.bf16.msra.mxu0 %v4117_v53 }
  0x7c   : > { %1783 = vmatprep.subr.bf16.mxu0 %v4122_v54 }
  0x7d   : > { %1132 = vmatpush1.bf16.msra.mxu1 %v3300_v41  ;;  %v4373_v41 = vld [vmem:[%s4998_s5 + $0xec] ss:$16 sps:$4 sm:$0xff]  }
  0x7e   : > { %1133 = vmatprep.subr.bf16.mxu1 %v3308_v43 }
  0x7f   : > { %1784 = vmatpush1.bf16.msra.mxu0 %v4136_v57 }
  0x80   : > { %1785 = vmatprep.subr.bf16.mxu0 %v4142_v58 }
  0x81   : > { %1134 = vmatpush1.bf16.msra.mxu1 %v3306_v46  ;;  %1417 = vmatmul.mubr.bf16.gmra.mrb[8].mxu0 %v4148_v60 }
  0x82   : > { %1135 = vmatprep.subr.bf16.mxu1 %v3314_v47  ;;  %1426 = vmatprep.mubr.bf16.mxu0 %v5008_v24 }
  0x83   : > { %1786 = vmatpush1.bf16.msra.mxu0 %v4157_v62 }
  0x84   : > { %1787 = vmatprep.subr.bf16.mxu0 %v4163_v0 }
  0x85   : > { %1136 = vmatpush1.bf16.msra.mxu1 %v3312_v50 }
  0x86   : > { %1137 = vmatprep.subr.bf16.mxu1 %v3320_v52 }
  0x87   : > { %1788 = vmatpush1.bf16.msra.mxu0 %v4177_v3 }
  0x88   : > { %1789 = vmatprep.subr.bf16.mxu0 %v4184_v4 }
  0x89   : > { %1138 = vmatpush1.bf16.msra.mxu1 %v3318_v55  ;;  %1427 = vmatmul.mubr.bf16.gmra.mrb[12].mxu0 %v4191_v5 }
  0x8a   : > { %1139 = vmatprep.subr.bf16.mxu1 %v3326_v56  ;;  %1436 = vmatprep.mubr.bf16.mxu0 %v5008_v24 }
  0x8b   : > { %1790 = vmatpush1.bf16.msra.mxu0 %v4200_v7 }
  0x8c   : > { %1791 = vmatprep.subr.bf16.mxu0 %v4206_v8 }
  0x8d   : > { %1140 = vmatpush1.bf16.msra.mxu1 %v3324_v59 }
  0x8e   : > { %1447 = vmatprep.subr.bf16.mxu1 %v3332_v61  ;;  %v728_v61 = vlaneseq }
  0x8f   : > { %1792 = vmatpush1.bf16.msra.mxu0 %v4220_v11 }
  0x90   : > { %1142 = vmatmul.mubr.bf16.vlgmr.msra.gmra.mrb[4].mxu1 %v4008_v18  ;;  %1793 = vmatprep.subr.bf16.mxu0 %v4226_v12  ;;  %v3354_v18 = vld [vmem:[%s4995_s2 + $0x88] ss:$16 sps:$4 sm:$0xff]  }
  0x91   : > { %1448 = vmatpush1.bf16.msra.mxu1 %v3330_v1  ;;  %1479 = vmatprep.mubr.bf16.mxu1 %v5008_v24  ;;  %v4425_v1 = vshrl.u32 %v728_v61, 7 }
  0x92   : > { %1449 = vmatprep.subr.bf16.mxu1 %v3338_v2  ;;  %1437 = vmatmul.mubr.bf16.gmra.mrb[16].mxu0 %v4232_v14 }
  0x93   : > { %1813 = vmatprep.mubr.bf16.mxu0 %v5008_v24  ;;  %1794 = vmatpush1.bf16.msra.mxu0 %v4241_v16  ;;  %5012 = vst [vmem:[#allocation3_spill] sm:$0xff] %v4425_v1  ;;  %v5007_v2 = vsub.s32 0, %v4425_v1 }
  0x94   : > { %1795 = vmatprep.subr.bf16.mxu0 %v4247_v17 }
  0x95   : > { %1450 = vmatpush1.bf16.msra.mxu1 %v3336_v26  ;;  %v726_v26 = vld [vmem:[%s4997_s4] sm:$0xf] }
  0x96   : > { %1451 = vmatprep.subr.bf16.mxu1 %v3344_v6  ;;  %v731_v6 = vrot.slane %v726_v26, %v5007_v2 }
  0x97   : > { %1796 = vmatpush1.bf16.msra.mxu0 %v4261_v20 }
  0x98   : > { %1890 = vmatprep.subr.bf16.mxu0 %v4102_v49 }
  0x99   : > { %1452 = vmatpush1.bf16.msra.mxu1 %v3342_v9 }
  0x9a   : > { %1453 = vmatprep.subr.bf16.mxu1 %v3350_v10 }
  0x9d   : > { %1454 = vmatpush1.bf16.msra.mxu1 %v3348_v13 }
  0x9e   : > { %1455 = vmatprep.subr.bf16.mxu1 %v3356_v15 }
  0xa1   : > { %1456 = vmatpush1.bf16.msra.mxu1 %v3354_v18 }
  0xa2   : > { %1457 = vmatprep.subr.bf16.mxu1 %v3362_v19 }
  0xa5   : > { %1458 = vmatpush1.bf16.msra.mxu1 %v3360_v21 }
  0xa6   : > { %1459 = vmatprep.subr.bf16.mxu1 %v3368_v63 }
  0xa9   : > { %1460 = vmatpush1.bf16.msra.mxu1 %v3366_v22 }
  0xaa   : > { %1461 = vmatprep.subr.bf16.mxu1 %v3372_v23 }
  0xad   : > { %1462 = vmatpush1.bf16.msra.mxu1 %v3370_v25 }
  0xae   : > { %1822 = vmatprep.subr.bf16.mxu1 %v4284_v27 }
  0xb0   : > { %1480 = vmatmul.mubr.bf16.vlgmr.msra.gmra.mrb[8].mxu1 %v4108_v51 }
  0xb1   : > { %1489 = vmatprep.mubr.bf16.mxu1 %v5008_v24  ;;  %1823 = vmatpush1.bf16.msra.mxu1 %v4289_v28 }
  0xb2   : > { %1824 = vmatprep.subr.bf16.mxu1 %v4295_v29 }
  0xb5   : > { %1825 = vmatpush1.bf16.msra.mxu1 %v4303_v30 }
  0xb6   : > { %1826 = vmatprep.subr.bf16.mxu1 %v4309_v31 }
  0xb8   : > { %1490 = vmatmul.mubr.bf16.gmra.mrb[12].mxu1 %v4148_v60 }
  0xb9   : > { %1499 = vmatprep.mubr.bf16.mxu1 %v5008_v24  ;;  %1827 = vmatpush1.bf16.msra.mxu1 %v4315_v32 }
  0xba   : > { %1828 = vmatprep.subr.bf16.mxu1 %v4321_v33 }
  0xbd   : > { %1829 = vmatpush1.bf16.msra.mxu1 %v4329_v34 }
  0xbe   : > { %1830 = vmatprep.subr.bf16.mxu1 %v4335_v35 }
  0xc0   : > { %1500 = vmatmul.mubr.bf16.gmra.mrb[16].mxu1 %v4191_v5  ;;  %v5006_v5 = vsub.s32 1, %v4425_v1 }
  0xc1   : > { %1509 = vmatprep.mubr.bf16.mxu1 %v5008_v24  ;;  %1831 = vmatpush1.bf16.msra.mxu1 %v4341_v36 }
  0xc2   : > { %1832 = vmatprep.subr.bf16.mxu1 %v4347_v37  ;;  %v735_v9 = vrot.slane %v726_v26, %v5006_v5 }
  0xc5   : > { %1833 = vmatpush1.bf16.msra.mxu1 %v4355_v38 }
  0xc6   : > { %1834 = vmatprep.subr.bf16.mxu1 %v4361_v39 }
  0xc8   : > { %1510 = vmatmul.mubr.bf16.gmra.mrb[20].mxu1 %v4232_v14 }
  0xc9   : > { %1835 = vmatpush1.bf16.msra.mxu1 %v4367_v40  ;;  %1854 = vmatprep.mubr.bf16.mxu1 %v5008_v24 }
  0xca   : > { %1836 = vmatprep.subr.bf16.mxu1 %v4373_v41 }
  0xcd   : > { %1837 = vmatpush1.bf16.msra.mxu1 %v4380_v42 }
  0xce   : > { %1931 = vmatprep.subr.bf16.mxu1 %v4284_v27 }
 0x103   : > { %v3117_v43 = vpop.f32.mrb[0].mxu1 }
 0x104   : > { %v3118_v45 = vpop.f32.mrb[1].mxu1 }
 0x105   : > { %v3119_v46 = vadd.f32 %v3118_v45, %v3117_v43 }
 0x107   : > { %v548_v47 = vadd.f32 %v3119_v46, %v2931_v44 }
 0x109   : > { %v1620_v48 = vpack.c.bf16 %v548_v47, %v548_v47 }
 0x10b   : > { %1814 = vmatmul.mubr.bf16.vlgmr.msra.gmra.mrb[20].mxu0 %v1620_v48  ;;  %1855 = vmatmul.mubr.bf16.vlgmr.msra.gmra.mrb[24].mxu1 %v1620_v48 }
 0x10c   : > { %1891 = vmatpush1.bf16.msra.mxu0 %v4117_v53  ;;  %1932 = vmatpush1.bf16.msra.mxu1 %v4289_v28 }
 0x10d   : > { %1892 = vmatprep.subr.bf16.mxu0 %v4122_v54  ;;  %1933 = vmatprep.subr.bf16.mxu1 %v4295_v29 }
 0x10e   : > { %1922 = vmatprep.mubr.bf16.mxu0 %v5008_v24  ;;  %1963 = vmatprep.mubr.bf16.mxu1 %v5008_v24 }
 0x110   : > { %1893 = vmatpush1.bf16.msra.mxu0 %v4136_v57  ;;  %1934 = vmatpush1.bf16.msra.mxu1 %v4303_v30 }
 0x111   : > { %1894 = vmatprep.subr.bf16.mxu0 %v4142_v58  ;;  %1935 = vmatprep.subr.bf16.mxu1 %v4309_v31 }
 0x114   : > { %1895 = vmatpush1.bf16.msra.mxu0 %v4157_v62  ;;  %1936 = vmatpush1.bf16.msra.mxu1 %v4315_v32 }
 0x115   : > { %1896 = vmatprep.subr.bf16.mxu0 %v4163_v0  ;;  %1937 = vmatprep.subr.bf16.mxu1 %v4321_v33 }
 0x118   : > { %1897 = vmatpush1.bf16.msra.mxu0 %v4177_v3  ;;  %1938 = vmatpush1.bf16.msra.mxu1 %v4329_v34 }
 0x119   : > { %1898 = vmatprep.subr.bf16.mxu0 %v4184_v4  ;;  %1939 = vmatprep.subr.bf16.mxu1 %v4335_v35 }
 0x11c   : > { %1899 = vmatpush1.bf16.msra.mxu0 %v4200_v7  ;;  %1940 = vmatpush1.bf16.msra.mxu1 %v4341_v36 }
 0x11d   : > { %1900 = vmatprep.subr.bf16.mxu0 %v4206_v8  ;;  %1941 = vmatprep.subr.bf16.mxu1 %v4347_v37 }
 0x120   : > { %1901 = vmatpush1.bf16.msra.mxu0 %v4220_v11  ;;  %1942 = vmatpush1.bf16.msra.mxu1 %v4355_v38 }
 0x121   : > { %1902 = vmatprep.subr.bf16.mxu0 %v4226_v12  ;;  %1943 = vmatprep.subr.bf16.mxu1 %v4361_v39 }
 0x123   : > { %v3152_v50 = vpop.f32.mrb[2].mxu1 }
 0x124   : > { %v3153_v51 = vpop.f32.mrb[3].mxu1  ;;  %1903 = vmatpush1.bf16.msra.mxu0 %v4241_v16  ;;  %1944 = vmatpush1.bf16.msra.mxu1 %v4367_v40 }
 0x125   : > { %v4417_v52 = vadd.f32 %v3153_v51, %v3152_v50  ;;  %1904 = vmatprep.subr.bf16.mxu0 %v4247_v17  ;;  %1945 = vmatprep.subr.bf16.mxu1 %v4373_v41 }
 0x128   : > { %1905 = vmatpush1.bf16.msra.mxu0 %v4261_v20  ;;  %1946 = vmatpush1.bf16.msra.mxu1 %v4380_v42 }
 0x129   : > { %1999 = vmatprep.subr.bf16.mxu0 %v4102_v49  ;;  %2040 = vmatprep.subr.bf16.mxu1 %v4284_v27 }
 0x12c   : > { %v1102_v55 = vpop.f32.mrb[0].mxu0 }
 0x12d   : > { %v1104_v56 = vpop.f32.mrb[1].mxu0  ;;  %v1103_v10 = vadd.f32 %v1102_v55, %v731_v6 }
 0x12e   : > { %v1106_v59 = vpop.f32.mrb[2].mxu0  ;;  %v1105_v13 = vadd.f32 %v1104_v56, %v735_v9 }
 0x12f   : > { %v1107_v60 = vpop.f32.mrb[3].mxu0 }
 0x14c   : > { %v1408_v14 = vpop.f32.mrb[4].mxu0 }
 0x14d   : > { %v4436_v15 = vadd.f32 %v1408_v14, %v1103_v10  ;;  %v1410_v18 = vpop.f32.mrb[5].mxu0 }
 0x14e   : > { %v4438_v19 = vadd.f32 %v1410_v18, %v1105_v13  ;;  %v1412_v21 = vpop.f32.mrb[6].mxu0 }
 0x14f   : > { %v4440_v63 = vadd.f32 %v1412_v21, %v1103_v10  ;;  %v1414_v22 = vpop.f32.mrb[7].mxu0 }
 0x150   : > { %v4442_v23 = vadd.f32 %v1414_v22, %v1105_v13 }
 0x154   : > { %v1418_v25 = vpop.f32.mrb[8].mxu0 }
 0x155   : > { %v4444_v43 = vadd.f32 %v1418_v25, %v1103_v10  ;;  %v1420_v44 = vpop.f32.mrb[9].mxu0 }
 0x156   : > { %v4446_v45 = vadd.f32 %v1420_v44, %v1105_v13  ;;  %v1422_v46 = vpop.f32.mrb[10].mxu0 }
 0x157   : > { %v4448_v48 = vadd.f32 %v1422_v46, %v1103_v10  ;;  %v1424_v50 = vpop.f32.mrb[11].mxu0 }
 0x158   : > { %v4450_v55 = vadd.f32 %v1424_v50, %v1105_v13 }
 0x159   : > { %5013 = vst [vmem:[#allocation4_spill] sm:$0xff] %v4448_v48 }
 0x15a   : > { %5014 = vst [vmem:[#allocation5_spill] sm:$0xff] %v4450_v55 }
 0x15c   : > { %v1428_v60 = vpop.f32.mrb[12].mxu0 }
 0x15d   : > { %v4452_v61 = vadd.f32 %v1428_v60, %v1103_v10  ;;  %v1430_v6 = vpop.f32.mrb[13].mxu0 }
 0x15e   : > { %v4454_v9 = vadd.f32 %v1430_v6, %v1105_v13  ;;  %v1432_v14 = vpop.f32.mrb[14].mxu0  ;;  %v738_v6 = vsub.s32 2, %v4425_v1 }
 0x15f   : > { %5015 = vst [vmem:[#allocation6_spill] sm:$0xff] %v4452_v61  ;;  %v4456_v18 = vadd.f32 %v1432_v14, %v1103_v10  ;;  %v1434_v21 = vpop.f32.mrb[15].mxu0  ;;  %v742_v14 = vsub.s32 3, %v4425_v1 }
 0x160   : > { %5016 = vst [vmem:[#allocation7_spill] sm:$0xff] %v4454_v9  ;;  %v4458_v22 = vadd.f32 %v1434_v21, %v1105_v13  ;;  %v739_v2 = vrot.slane %v726_v26, %v738_v6 }
 0x161   : > { %5017 = vst [vmem:[#allocation8_spill] sm:$0xff] %v4456_v18  ;;  %v743_v24 = vrot.slane %v726_v26, %v742_v14 }
 0x162   : > { %5018 = vst [vmem:[#allocation9_spill] sm:$0xff] %v4458_v22 }
 0x163   : > { %v1143_v47 = vpop.f32.mrb[4].mxu1 }
 0x164   : > { %v1145_v51 = vpop.f32.mrb[5].mxu1  ;;  %v1144_v21 = vadd.f32 %v1143_v47, %v739_v2 }
 0x165   : > { %v1147_v56 = vpop.f32.mrb[6].mxu1  ;;  %v1438_v25 = vpop.f32.mrb[16].mxu0  ;;  %v1146_v22 = vadd.f32 %v1145_v51, %v743_v24 }
 0x166   : > { %v1148_v59 = vpop.f32.mrb[7].mxu1  ;;  %v4460_v44 = vadd.f32 %v1438_v25, %v1103_v10  ;;  %v1440_v46 = vpop.f32.mrb[17].mxu0 }
 0x167   : > { %v4462_v50 = vadd.f32 %v1440_v46, %v1105_v13  ;;  %v1442_v56 = vpop.f32.mrb[18].mxu0 }
 0x168   : > { %5019 = vst [vmem:[#allocation10_spill] sm:$0xff] %v4460_v44  ;;  %v4464_v59 = vadd.f32 %v1442_v56, %v1103_v10  ;;  %v1444_v60 = vpop.f32.mrb[19].mxu0 }
 0x169   : > { %5020 = vst [vmem:[#allocation11_spill] sm:$0xff] %v4462_v50  ;;  %v4466_v5 = vadd.f32 %v1444_v60, %v1105_v13 }
 0x16a   : > { %5021 = vst [vmem:[#allocation12_spill] sm:$0xff] %v4464_v59 }
 0x16b   : > { %5022 = vst [vmem:[#allocation13_spill] sm:$0xff] %v4466_v5 }
 0x183   : > { %v1481_v18 = vpop.f32.mrb[8].mxu1 }
 0x184   : > { %v1522_v25 = vadd.f32 %v1481_v18, %v1144_v21  ;;  %v1483_v44 = vpop.f32.mrb[9].mxu1 }
 0x185   : > { %v1523_v9 = vadd.f32 %v1483_v44, %v1146_v22  ;;  %v1485_v46 = vpop.f32.mrb[10].mxu1 }
 0x186   : > { %v4470_v50 = vadd.f32 %v1485_v46, %v1144_v21  ;;  %v1487_v10 = vpop.f32.mrb[11].mxu1 }
 0x187   : > { %v4472_v56 = vadd.f32 %v1487_v10, %v1146_v22 }
 0x18b   : > { %v1491_v13 = vpop.f32.mrb[12].mxu1 }
 0x18c   : > { %v4474_v60 = vadd.f32 %v1491_v13, %v1144_v21  ;;  %v1493_v5 = vpop.f32.mrb[13].mxu1 }
 0x18d   : > { %v4476_v59 = vadd.f32 %v1493_v5, %v1146_v22  ;;  %v1495_v6 = vpop.f32.mrb[14].mxu1 }
 0x18e   : > { %v4478_v26 = vadd.f32 %v1495_v6, %v1144_v21  ;;  %v1497_v24 = vpop.f32.mrb[15].mxu1 }
 0x18f   : > { %v4480_v2 = vadd.f32 %v1497_v24, %v1146_v22 }
 0x190   : > { %5023 = vst [vmem:[#allocation14_spill] sm:$0xff] %v4478_v26 }
 0x191   : > { %5024 = vst [vmem:[#allocation15_spill] sm:$0xff] %v4480_v2 }
 0x193   : > { %v1501_v47 = vpop.f32.mrb[16].mxu1 }
 0x194   : > { %v4482_v51 = vadd.f32 %v1501_v47, %v1144_v21  ;;  %v1503_v18 = vpop.f32.mrb[17].mxu1 }
 0x195   : > { %v4484_v44 = vadd.f32 %v1503_v18, %v1146_v22  ;;  %v1505_v14 = vpop.f32.mrb[18].mxu1 }
 0x196   : > { %5025 = vst [vmem:[#allocation16_spill] sm:$0xff] %v4482_v51  ;;  %v4486_v46 = vadd.f32 %v1505_v14, %v1144_v21  ;;  %v1507_v10 = vpop.f32.mrb[19].mxu1 }
 0x197   : > { %5026 = vst [vmem:[#allocation17_spill] sm:$0xff] %v4484_v44  ;;  %v4488_v13 = vadd.f32 %v1507_v10, %v1146_v22 }
 0x198   : > { %5027 = vst [vmem:[#allocation18_spill] sm:$0xff] %v4486_v46 }
 0x199   : > { %5028 = vst [vmem:[#allocation19_spill] sm:$0xff] %v4488_v13 }
 0x19b   : > { %v1511_v5 = vpop.f32.mrb[20].mxu1 }
 0x19c   : > { %v4490_v1 = vadd.f32 %v1511_v5, %v1144_v21  ;;  %v1513_v6 = vpop.f32.mrb[21].mxu1 }
 0x19d   : > { %v4492_v61 = vadd.f32 %v1513_v6, %v1146_v22  ;;  %v1515_v24 = vpop.f32.mrb[22].mxu1 }
 0x19e   : > { %5029 = vst [vmem:[#allocation20_spill] sm:$0xff] %v4490_v1  ;;  %v4494_v2 = vadd.f32 %v1515_v24, %v1144_v21  ;;  %v1517_v47 = vpop.f32.mrb[23].mxu1 }
 0x19f   : > { %5030 = vst [vmem:[#allocation21_spill] sm:$0xff] %v4492_v61  ;;  %v4496_v51 = vadd.f32 %v1517_v47, %v1146_v22 }
 0x1a1   : > { %5031 = vst [vmem:[#allocation22_spill] sm:$0xff] %v4496_v51 }
 0x1de   : > { %v1815_v18 = vpop.f32.mrb[20].mxu0  ;;  %v1856_v44 = vpop.f32.mrb[24].mxu1 }
 0x1df   : > { %v1863_v14 = vadd.f32 %v1815_v18, %v4436_v15  ;;  %v1865_v46 = vadd.f32 %v1856_v44, %v1522_v25  ;;  %v1817_v55 = vpop.f32.mrb[21].mxu0  ;;  %v1858_v10 = vpop.f32.mrb[25].mxu1  ;;  %v2932_v15 = vld [vmem:[%s5004_s11] ss:$0 sm:$0xff] }
 0x1e0   : > { %v1864_v13 = vadd.f32 %v1817_v55, %v4438_v19  ;;  %v1866_v5 = vadd.f32 %v1858_v10, %v1523_v9  ;;  %v1819_v1 = vpop.f32.mrb[22].mxu0  ;;  %v1860_v26 = vpop.f32.mrb[26].mxu1  ;;  %v657_v55 = vadd.f32 %v4417_v52, %v2932_v15  ;;  %v5032_v52 = vmov 0  }
 0x1e1   : > { %v1867_v6 = vmul.f32 0.5, %v1863_v14  ;;  %v1820_v61 = vpop.f32.mrb[23].mxu0  ;;  %v1861_v48 = vpop.f32.mrb[27].mxu1  ;;  %v1869_v22 = vmul.f32 0.5, %v1865_v46 }
 0x1e2   : > { %v1868_v21 = vmul.f32 0.5, %v1864_v13 }
 0x1e3   : > { %3448 = vtanh.f32 %v1867_v6 }
 0x1e4   : > { %3450 = vtanh.f32 %v1868_v21 }
 0x1e5   : > { %3452 = vtanh.f32 %v1866_v5 }
 0x1e6   : > { %3454 = vtanh.f32 %v1869_v22 }
 0x1ed   : > { %v3449_v24 = vpop.eup %3448 }
 0x1ee   : > { %v1873_v47 = vadd.f32 1.0, %v3449_v24  ;;  %v3451_v51 = vpop.eup %3450 }
 0x1ef   : > { %v1874_v19 = vadd.f32 1.0, %v3451_v51  ;;  %v3453_v1 = vpop.eup %3452 }
 0x1f0   : > { %v1876_v25 = vmul.f32 0.5, %v1873_v47  ;;  %v3455_v44 = vpop.eup %3454 }
 0x1f1   : > { %v1877_v61 = vmul.f32 0.5, %v1874_v19  ;;  %v1875_v46 = vadd.f32 1.0, %v3455_v44 }
 0x1f2   : > { %v1881_v48 = vmul.f32 %v3453_v1, %v1876_v25 }
 0x1f3   : > { %v1880_v9 = vmul.f32 %v1877_v61, %v657_v55  ;;  %v1878_v13 = vmul.f32 0.5, %v1875_v46 }
 0x1f5   : > { %v4504_v26 = vadd.f32 %v1881_v48, %v1880_v9 }
 0x1f7   : > { %3456 = vtanh.f32 %v4504_v26 }
 0x201   : > { %v3457_v18 = vpop.eup %3456 }
 0x202   : > { %v4507_v14 = vmul.f32 %v3457_v18, %v1878_v13 }
 0x204   : > { %v1889_v10 = vpack.c.bf16 %v4507_v14, %v4507_v14 }
 0x206   : > { %1923 = vmatmul.mubr.bf16.vlgmr.msra.gmra.mrb[24].mxu0 %v1889_v10  ;;  %1964 = vmatmul.mubr.bf16.vlgmr.msra.gmra.mrb[28].mxu1 %v1889_v10 }
 0x207   : > { %2000 = vmatpush1.bf16.msra.mxu0 %v4117_v53  ;;  %2041 = vmatpush1.bf16.msra.mxu1 %v4289_v28 }
 0x208   : > { %2001 = vmatprep.subr.bf16.mxu0 %v4122_v54  ;;  %2042 = vmatprep.subr.bf16.mxu1 %v4295_v29 }
 0x209   : > { %2031 = vmatprep.mubr.bf16.mxu0 %v5032_v52  ;;  %2072 = vmatprep.mubr.bf16.mxu1 %v5032_v52 }
 0x20b   : > { %2002 = vmatpush1.bf16.msra.mxu0 %v4136_v57  ;;  %2043 = vmatpush1.bf16.msra.mxu1 %v4303_v30 }
 0x20c   : > { %2003 = vmatprep.subr.bf16.mxu0 %v4142_v58  ;;  %2044 = vmatprep.subr.bf16.mxu1 %v4309_v31 }
 0x20f   : > { %2004 = vmatpush1.bf16.msra.mxu0 %v4157_v62  ;;  %2045 = vmatpush1.bf16.msra.mxu1 %v4315_v32 }
 0x210   : > { %2005 = vmatprep.subr.bf16.mxu0 %v4163_v0  ;;  %2046 = vmatprep.subr.bf16.mxu1 %v4321_v33 }
 0x213   : > { %2006 = vmatpush1.bf16.msra.mxu0 %v4177_v3  ;;  %2047 = vmatpush1.bf16.msra.mxu1 %v4329_v34 }
 0x214   : > { %2007 = vmatprep.subr.bf16.mxu0 %v4184_v4  ;;  %2048 = vmatprep.subr.bf16.mxu1 %v4335_v35 }
 0x217   : > { %2008 = vmatpush1.bf16.msra.mxu0 %v4200_v7  ;;  %2049 = vmatpush1.bf16.msra.mxu1 %v4341_v36 }
 0x218   : > { %2009 = vmatprep.subr.bf16.mxu0 %v4206_v8  ;;  %2050 = vmatprep.subr.bf16.mxu1 %v4347_v37 }
 0x21b   : > { %2010 = vmatpush1.bf16.msra.mxu0 %v4220_v11  ;;  %2051 = vmatpush1.bf16.msra.mxu1 %v4355_v38 }
 0x21c   : > { %2011 = vmatprep.subr.bf16.mxu0 %v4226_v12  ;;  %2052 = vmatprep.subr.bf16.mxu1 %v4361_v39 }
 0x21f   : > { %2012 = vmatpush1.bf16.msra.mxu0 %v4241_v16  ;;  %2053 = vmatpush1.bf16.msra.mxu1 %v4367_v40 }
 0x220   : > { %2013 = vmatprep.subr.bf16.mxu0 %v4247_v17  ;;  %2054 = vmatprep.subr.bf16.mxu1 %v4373_v41 }
 0x223   : > { %2014 = vmatpush1.bf16.msra.mxu0 %v4261_v20  ;;  %2055 = vmatpush1.bf16.msra.mxu1 %v4380_v42 }
 0x224   : > { %2108 = vmatprep.subr.bf16.mxu0 %v4102_v49  ;;  %2149 = vmatprep.subr.bf16.mxu1 %v4284_v27 }
 0x2d9   : > { %v1924_v51 = vpop.f32.mrb[24].mxu0  ;;  %v1965_v5 = vpop.f32.mrb[28].mxu1 }
 0x2da   : > { %v1972_v6 = vadd.f32 %v1924_v51, %v4440_v63  ;;  %v1974_v21 = vadd.f32 %v1965_v5, %v4470_v50  ;;  %v1926_v22 = vpop.f32.mrb[25].mxu0  ;;  %v1967_v24 = vpop.f32.mrb[29].mxu1 }
 0x2db   : > { %v1973_v47 = vadd.f32 %v1926_v22, %v4442_v23  ;;  %v1975_v15 = vadd.f32 %v1967_v24, %v4472_v56  ;;  %v1928_v25 = vpop.f32.mrb[26].mxu0  ;;  %v1969_v19 = vpop.f32.mrb[30].mxu1 }
 0x2dc   : > { %v1976_v1 = vmul.f32 0.5, %v1972_v6  ;;  %v1929_v55 = vpop.f32.mrb[27].mxu0  ;;  %v1970_v61 = vpop.f32.mrb[31].mxu1  ;;  %v1978_v9 = vmul.f32 0.5, %v1974_v21 }
 0x2dd   : > { %v1977_v48 = vmul.f32 0.5, %v1973_v47 }
 0x2de   : > { %3458 = vtanh.f32 %v1976_v1 }
 0x2df   : > { %3460 = vtanh.f32 %v1977_v48 }
 0x2e0   : > { %3462 = vtanh.f32 %v1975_v15 }
 0x2e1   : > { %3464 = vtanh.f32 %v1978_v9 }
 0x2e8   : > { %v3459_v44 = vpop.eup %3458 }
 0x2e9   : > { %v1982_v63 = vadd.f32 1.0, %v3459_v44  ;;  %v3461_v46 = vpop.eup %3460 }
 0x2ea   : > { %v1983_v13 = vadd.f32 1.0, %v3461_v46  ;;  %v3463_v18 = vpop.eup %3462 }
 0x2eb   : > { %v1985_v50 = vmul.f32 0.5, %v1982_v63  ;;  %v3465_v5 = vpop.eup %3464 }
 0x2ec   : > { %v1986_v23 = vmul.f32 0.5, %v1983_v13  ;;  %v1984_v6 = vadd.f32 1.0, %v3465_v5 }
 0x2ed   : > { %v1990_v10 = vmul.f32 %v3463_v18, %v1985_v50 }
 0x2ee   : > { %v1989_v56 = vmul.f32 %v1986_v23, %v4504_v26  ;;  %v1987_v22 = vmul.f32 0.5, %v1984_v6 }
 0x2f0   : > { %v4550_v51 = vadd.f32 %v1990_v10, %v1989_v56 }
 0x2f2   : > { %3466 = vtanh.f32 %v4550_v51 }
 0x2fc   : > { %v3467_v24 = vpop.eup %3466 }
 0x2fd   : > { %v4553_v21 = vmul.f32 %v3467_v24, %v1987_v22 }
 0x2ff   : > { %v1998_v47 = vpack.c.bf16 %v4553_v21, %v4553_v21 }
 0x301   : > { %2032 = vmatmul.mubr.bf16.vlgmr.msra.gmra.mrb[28].mxu0 %v1998_v47  ;;  %2073 = vmatmul.mubr.bf16.vlgmr.msra.gmra.mrb[32].mxu1 %v1998_v47 }
 0x302   : > { %2109 = vmatpush1.bf16.msra.mxu0 %v4117_v53  ;;  %2150 = vmatpush1.bf16.msra.mxu1 %v4289_v28 }
 0x303   : > { %2110 = vmatprep.subr.bf16.mxu0 %v4122_v54  ;;  %2151 = vmatprep.subr.bf16.mxu1 %v4295_v29 }
 0x304   : > { %2140 = vmatprep.mubr.bf16.mxu0 %v5032_v52  ;;  %2181 = vmatprep.mubr.bf16.mxu1 %v5032_v52 }
 0x306   : > { %2111 = vmatpush1.bf16.msra.mxu0 %v4136_v57  ;;  %2152 = vmatpush1.bf16.msra.mxu1 %v4303_v30 }
 0x307   : > { %2112 = vmatprep.subr.bf16.mxu0 %v4142_v58  ;;  %2153 = vmatprep.subr.bf16.mxu1 %v4309_v31 }
 0x30a   : > { %2113 = vmatpush1.bf16.msra.mxu0 %v4157_v62  ;;  %2154 = vmatpush1.bf16.msra.mxu1 %v4315_v32 }
 0x30b   : > { %2114 = vmatprep.subr.bf16.mxu0 %v4163_v0  ;;  %2155 = vmatprep.subr.bf16.mxu1 %v4321_v33 }
 0x30e   : > { %2115 = vmatpush1.bf16.msra.mxu0 %v4177_v3  ;;  %2156 = vmatpush1.bf16.msra.mxu1 %v4329_v34 }
 0x30f   : > { %2116 = vmatprep.subr.bf16.mxu0 %v4184_v4  ;;  %2157 = vmatprep.subr.bf16.mxu1 %v4335_v35 }
 0x312   : > { %2117 = vmatpush1.bf16.msra.mxu0 %v4200_v7  ;;  %2158 = vmatpush1.bf16.msra.mxu1 %v4341_v36 }
 0x313   : > { %2118 = vmatprep.subr.bf16.mxu0 %v4206_v8  ;;  %2159 = vmatprep.subr.bf16.mxu1 %v4347_v37 }
 0x316   : > { %2119 = vmatpush1.bf16.msra.mxu0 %v4220_v11  ;;  %2160 = vmatpush1.bf16.msra.mxu1 %v4355_v38 }
 0x317   : > { %2120 = vmatprep.subr.bf16.mxu0 %v4226_v12  ;;  %2161 = vmatprep.subr.bf16.mxu1 %v4361_v39 }
 0x31a   : > { %2121 = vmatpush1.bf16.msra.mxu0 %v4241_v16  ;;  %2162 = vmatpush1.bf16.msra.mxu1 %v4367_v40 }
 0x31b   : > { %2122 = vmatprep.subr.bf16.mxu0 %v4247_v17  ;;  %2163 = vmatprep.subr.bf16.mxu1 %v4373_v41 }
 0x31e   : > { %2123 = vmatpush1.bf16.msra.mxu0 %v4261_v20  ;;  %2164 = vmatpush1.bf16.msra.mxu1 %v4380_v42 }
 0x31f   : > { %2217 = vmatprep.subr.bf16.mxu0 %v4102_v49  ;;  %2258 = vmatprep.subr.bf16.mxu1 %v4284_v27 }
 0x3d4   : > { %v2033_v26 = vpop.f32.mrb[28].mxu0  ;;  %v2074_v15 = vpop.f32.mrb[32].mxu1 }
 0x3d5   : > { %v2081_v25 = vadd.f32 %v2033_v26, %v4444_v43  ;;  %v2083_v19 = vadd.f32 %v2074_v15, %v4474_v60  ;;  %v2035_v1 = vpop.f32.mrb[29].mxu0  ;;  %v2076_v55 = vpop.f32.mrb[33].mxu1 }
 0x3d6   : > { %v2082_v61 = vadd.f32 %v2035_v1, %v4446_v45  ;;  %v2084_v48 = vadd.f32 %v2076_v55, %v4476_v59  ;;  %v2037_v9 = vpop.f32.mrb[30].mxu0  ;;  %v2078_v44 = vpop.f32.mrb[34].mxu1  ;;  %v5034_v55 = vld [vmem:[#allocation14_spill] sm:$0xff] }
 0x3d7   : > { %v2085_v63 = vmul.f32 0.5, %v2081_v25  ;;  %v2038_v46 = vpop.f32.mrb[31].mxu0  ;;  %v2079_v50 = vpop.f32.mrb[35].mxu1  ;;  %v2087_v18 = vmul.f32 0.5, %v2083_v19  ;;  %v5035_v44 = vld [vmem:[#allocation5_spill] sm:$0xff] }
 0x3d8   : > { %v2086_v13 = vmul.f32 0.5, %v2082_v61  ;;  %v5036_v46 = vld [vmem:[#allocation15_spill] sm:$0xff] }
 0x3d9   : > { %3468 = vtanh.f32 %v2085_v63 }
 0x3da   : > { %3470 = vtanh.f32 %v2086_v13 }
 0x3db   : > { %3472 = vtanh.f32 %v2084_v48 }
 0x3dc   : > { %3474 = vtanh.f32 %v2087_v18 }
 0x3e3   : > { %v3469_v23 = vpop.eup %3468 }
 0x3e4   : > { %v2091_v43 = vadd.f32 1.0, %v3469_v23  ;;  %v3471_v10 = vpop.eup %3470 }
 0x3e5   : > { %v2092_v56 = vadd.f32 1.0, %v3471_v10  ;;  %v3473_v5 = vpop.eup %3472 }
 0x3e6   : > { %v2094_v60 = vmul.f32 0.5, %v2091_v43  ;;  %v3475_v24 = vpop.eup %3474 }
 0x3e7   : > { %v2095_v45 = vmul.f32 0.5, %v2092_v56  ;;  %v2093_v47 = vadd.f32 1.0, %v3475_v24 }
 0x3e8   : > { %v2099_v6 = vmul.f32 %v3473_v5, %v2094_v60 }
 0x3e9   : > { %v2098_v59 = vmul.f32 %v2095_v45, %v4550_v51  ;;  %v2096_v26 = vmul.f32 0.5, %v2093_v47  ;;  %v5033_v51 = vld [vmem:[#allocation4_spill] sm:$0xff] }
 0x3eb   : > { %v4596_v22 = vadd.f32 %v2099_v6, %v2098_v59 }
 0x3ed   : > { %3476 = vtanh.f32 %v4596_v22 }
 0x3f7   : > { %v3477_v15 = vpop.eup %3476 }
 0x3f8   : > { %v4599_v25 = vmul.f32 %v3477_v15, %v2096_v26 }
 0x3fa   : > { %v2107_v19 = vpack.c.bf16 %v4599_v25, %v4599_v25 }
 0x3fc   : > { %2141 = vmatmul.mubr.bf16.vlgmr.msra.gmra.mrb[32].mxu0 %v2107_v19  ;;  %2182 = vmatmul.mubr.bf16.vlgmr.msra.gmra.mrb[36].mxu1 %v2107_v19 }
 0x3fd   : > { %2218 = vmatpush1.bf16.msra.mxu0 %v4117_v53  ;;  %2259 = vmatpush1.bf16.msra.mxu1 %v4289_v28 }
 0x3fe   : > { %2219 = vmatprep.subr.bf16.mxu0 %v4122_v54  ;;  %2260 = vmatprep.subr.bf16.mxu1 %v4295_v29 }
 0x3ff   : > { %2249 = vmatprep.mubr.bf16.mxu0 %v5032_v52  ;;  %2290 = vmatprep.mubr.bf16.mxu1 %v5032_v52 }
 0x401   : > { %2220 = vmatpush1.bf16.msra.mxu0 %v4136_v57  ;;  %2261 = vmatpush1.bf16.msra.mxu1 %v4303_v30 }
 0x402   : > { %2221 = vmatprep.subr.bf16.mxu0 %v4142_v58  ;;  %2262 = vmatprep.subr.bf16.mxu1 %v4309_v31 }
 0x405   : > { %2222 = vmatpush1.bf16.msra.mxu0 %v4157_v62  ;;  %2263 = vmatpush1.bf16.msra.mxu1 %v4315_v32 }
 0x406   : > { %2223 = vmatprep.subr.bf16.mxu0 %v4163_v0  ;;  %2264 = vmatprep.subr.bf16.mxu1 %v4321_v33 }
 0x409   : > { %2224 = vmatpush1.bf16.msra.mxu0 %v4177_v3  ;;  %2265 = vmatpush1.bf16.msra.mxu1 %v4329_v34 }
 0x40a   : > { %2225 = vmatprep.subr.bf16.mxu0 %v4184_v4  ;;  %2266 = vmatprep.subr.bf16.mxu1 %v4335_v35 }
 0x40d   : > { %2226 = vmatpush1.bf16.msra.mxu0 %v4200_v7  ;;  %2267 = vmatpush1.bf16.msra.mxu1 %v4341_v36 }
 0x40e   : > { %2227 = vmatprep.subr.bf16.mxu0 %v4206_v8  ;;  %2268 = vmatprep.subr.bf16.mxu1 %v4347_v37 }
 0x411   : > { %2228 = vmatpush1.bf16.msra.mxu0 %v4220_v11  ;;  %2269 = vmatpush1.bf16.msra.mxu1 %v4355_v38 }
 0x412   : > { %2229 = vmatprep.subr.bf16.mxu0 %v4226_v12  ;;  %2270 = vmatprep.subr.bf16.mxu1 %v4361_v39 }
 0x415   : > { %2230 = vmatpush1.bf16.msra.mxu0 %v4241_v16  ;;  %2271 = vmatpush1.bf16.msra.mxu1 %v4367_v40 }
 0x416   : > { %2231 = vmatprep.subr.bf16.mxu0 %v4247_v17  ;;  %2272 = vmatprep.subr.bf16.mxu1 %v4373_v41 }
 0x419   : > { %2232 = vmatpush1.bf16.msra.mxu0 %v4261_v20  ;;  %2273 = vmatpush1.bf16.msra.mxu1 %v4380_v42 }
 0x41a   : > { %2326 = vmatprep.subr.bf16.mxu0 %v4102_v49  ;;  %2367 = vmatprep.subr.bf16.mxu1 %v4284_v27 }
 0x4cf   : > { %v2142_v53 = vpop.f32.mrb[32].mxu0  ;;  %v2183_v54 = vpop.f32.mrb[36].mxu1 }
 0x4d0   : > { %v2190_v1 = vadd.f32 %v2142_v53, %v5033_v51  ;;  %v2192_v61 = vadd.f32 %v2183_v54, %v5034_v55  ;;  %v2144_v48 = vpop.f32.mrb[33].mxu0  ;;  %v2185_v9 = vpop.f32.mrb[37].mxu1 }
 0x4d1   : > { %v2191_v63 = vadd.f32 %v2144_v48, %v5035_v44  ;;  %v2193_v50 = vadd.f32 %v2185_v9, %v5036_v46  ;;  %v2146_v13 = vpop.f32.mrb[34].mxu0  ;;  %v2187_v18 = vpop.f32.mrb[38].mxu1  ;;  %v4652_v48 = vld [vmem:[%s4998_s5] ss:$16 sps:$4 sm:$0xff]  }
 0x4d2   : > { %v2194_v23 = vmul.f32 0.5, %v2190_v1  ;;  %v2147_v43 = vpop.f32.mrb[35].mxu0  ;;  %v2188_v10 = vpop.f32.mrb[39].mxu1  ;;  %v2196_v60 = vmul.f32 0.5, %v2192_v61 }
 0x4d3   : > { %v2195_v49 = vmul.f32 0.5, %v2191_v63 }
 0x4d4   : > { %3478 = vtanh.f32 %v2194_v23 }
 0x4d5   : > { %3480 = vtanh.f32 %v2195_v49 }
 0x4d6   : > { %3482 = vtanh.f32 %v2193_v50 }
 0x4d7   : > { %3484 = vtanh.f32 %v2196_v60 }
 0x4de   : > { %v3479_v56 = vpop.eup %3478 }
 0x4df   : > { %v2200_v5 = vadd.f32 1.0, %v3479_v56  ;;  %v3481_v45 = vpop.eup %3480 }
 0x4e0   : > { %v2201_v59 = vadd.f32 1.0, %v3481_v45  ;;  %v3483_v24 = vpop.eup %3482 }
 0x4e1   : > { %v2203_v6 = vmul.f32 0.5, %v2200_v5  ;;  %v3485_v53 = vpop.eup %3484 }
 0x4e2   : > { %v2204_v47 = vmul.f32 0.5, %v2201_v59  ;;  %v2202_v54 = vadd.f32 1.0, %v3485_v53 }
 0x4e3   : > { %v2208_v26 = vmul.f32 %v3483_v24, %v2203_v6 }
 0x4e4   : > { %v2207_v15 = vmul.f32 %v2204_v47, %v4596_v22  ;;  %v2205_v51 = vmul.f32 0.5, %v2202_v54  ;;  %v4659_v22 = vld [vmem:[%s4998_s5 + $0x24] ss:$16 sps:$4 sm:$0xff]  }
 0x4e6   : > { %v4642_v19 = vadd.f32 %v2208_v26, %v2207_v15 }
 0x4e8   : > { %3486 = vtanh.f32 %v4642_v19 }
 0x4f2   : > { %v3487_v1 = vpop.eup %3486 }
 0x4f3   : > { %v4645_v55 = vmul.f32 %v3487_v1, %v2205_v51  ;;  %v5041_v1 = vld [vmem:[#allocation8_spill] sm:$0xff] }
 0x4f5   : > { %v2216_v61 = vpack.c.bf16 %v4645_v55, %v4645_v55 }
 0x4f7   : > { %2250 = vmatmul.mubr.bf16.vlgmr.msra.gmra.mrb[36].mxu0 %v2216_v61  ;;  %2291 = vmatmul.mubr.bf16.vlgmr.msra.gmra.mrb[40].mxu1 %v2216_v61  ;;  %v5042_v61 = vld [vmem:[#allocation18_spill] sm:$0xff] }
 0x4f8   : > { %2327 = vmatpush1.bf16.msra.mxu0 %v4652_v48  ;;  %2368 = vmatpush1.bf16.msra.mxu1 %v4289_v28 }
 0x4f9   : > { %2328 = vmatprep.subr.bf16.mxu0 %v4659_v22  ;;  %2369 = vmatprep.subr.bf16.mxu1 %v4295_v29 }
 0x4fa   : > { %2358 = vmatprep.mubr.bf16.mxu0 %v5032_v52  ;;  %2399 = vmatprep.mubr.bf16.mxu1 %v5032_v52 }
 0x4fc   : > { %2329 = vmatpush1.bf16.msra.mxu0 %v4136_v57  ;;  %2370 = vmatpush1.bf16.msra.mxu1 %v4303_v30  ;;  %v4694_v57 = vld [vmem:[%s4998_s5 + $0x4] ss:$16 sps:$4 sm:$0xff]  }
 0x4fd   : > { %2330 = vmatprep.subr.bf16.mxu0 %v4142_v58  ;;  %2371 = vmatprep.subr.bf16.mxu1 %v4309_v31 }
 0x500   : > { %2331 = vmatpush1.bf16.msra.mxu0 %v4157_v62  ;;  %2372 = vmatpush1.bf16.msra.mxu1 %v4315_v32 }
 0x501   : > { %2332 = vmatprep.subr.bf16.mxu0 %v4163_v0  ;;  %2373 = vmatprep.subr.bf16.mxu1 %v4321_v33  ;;  %v5037_v0 = vld [vmem:[#allocation6_spill] sm:$0xff] }
 0x504   : > { %2333 = vmatpush1.bf16.msra.mxu0 %v4177_v3  ;;  %2374 = vmatpush1.bf16.msra.mxu1 %v4329_v34 }
 0x505   : > { %2334 = vmatprep.subr.bf16.mxu0 %v4184_v4  ;;  %2375 = vmatprep.subr.bf16.mxu1 %v4335_v35  ;;  %v5038_v4 = vld [vmem:[#allocation16_spill] sm:$0xff] }
 0x508   : > { %2335 = vmatpush1.bf16.msra.mxu0 %v4200_v7  ;;  %2376 = vmatpush1.bf16.msra.mxu1 %v4341_v36 }
 0x509   : > { %2336 = vmatprep.subr.bf16.mxu0 %v4206_v8  ;;  %2377 = vmatprep.subr.bf16.mxu1 %v4347_v37 }
 0x50c   : > { %2337 = vmatpush1.bf16.msra.mxu0 %v4220_v11  ;;  %2378 = vmatpush1.bf16.msra.mxu1 %v4355_v38 }
 0x50d   : > { %2338 = vmatprep.subr.bf16.mxu0 %v4226_v12  ;;  %2379 = vmatprep.subr.bf16.mxu1 %v4361_v39  ;;  %v5039_v12 = vld [vmem:[#allocation7_spill] sm:$0xff] }
 0x510   : > { %2339 = vmatpush1.bf16.msra.mxu0 %v4241_v16  ;;  %2380 = vmatpush1.bf16.msra.mxu1 %v4367_v40 }
 0x511   : > { %2340 = vmatprep.subr.bf16.mxu0 %v4247_v17  ;;  %2381 = vmatprep.subr.bf16.mxu1 %v4373_v41  ;;  %v5040_v17 = vld [vmem:[#allocation17_spill] sm:$0xff] }
 0x514   : > { %2341 = vmatpush1.bf16.msra.mxu0 %v4261_v20  ;;  %2382 = vmatpush1.bf16.msra.mxu1 %v4380_v42 }
 0x515   : > { %2435 = vmatprep.subr.bf16.mxu0 %v4694_v57  ;;  %2476 = vmatprep.subr.bf16.mxu1 %v4284_v27 }
 0x5ca   : > { %v2251_v58 = vpop.f32.mrb[36].mxu0  ;;  %v2292_v62 = vpop.f32.mrb[40].mxu1 }
 0x5cb   : > { %v2299_v3 = vadd.f32 %v2251_v58, %v5037_v0  ;;  %v2301_v7 = vadd.f32 %v2292_v62, %v5038_v4  ;;  %v2253_v8 = vpop.f32.mrb[37].mxu0  ;;  %v2294_v11 = vpop.f32.mrb[41].mxu1 }
 0x5cc   : > { %v2300_v16 = vadd.f32 %v2253_v8, %v5039_v12  ;;  %v2302_v20 = vadd.f32 %v2294_v11, %v5040_v17  ;;  %v2255_v9 = vpop.f32.mrb[38].mxu0  ;;  %v2296_v44 = vpop.f32.mrb[42].mxu1 }
 0x5cd   : > { %v2303_v63 = vmul.f32 0.5, %v2299_v3  ;;  %v2256_v46 = vpop.f32.mrb[39].mxu0  ;;  %v2297_v50 = vpop.f32.mrb[43].mxu1  ;;  %v2305_v27 = vmul.f32 0.5, %v2301_v7  ;;  %v5043_v3 = vld [vmem:[#allocation9_spill] sm:$0xff]  ;;  %v5044_v7 = vld [vmem:[#allocation19_spill] sm:$0xff] }
 0x5ce   : > { %v2304_v13 = vmul.f32 0.5, %v2300_v16 }
 0x5cf   : > { %3488 = vtanh.f32 %v2303_v63 }
 0x5d0   : > { %3490 = vtanh.f32 %v2304_v13 }
 0x5d1   : > { %3492 = vtanh.f32 %v2302_v20 }
 0x5d2   : > { %3494 = vtanh.f32 %v2305_v27 }
 0x5d9   : > { %v3489_v18 = vpop.eup %3488 }
 0x5da   : > { %v2309_v23 = vadd.f32 1.0, %v3489_v18  ;;  %v3491_v43 = vpop.eup %3490 }
 0x5db   : > { %v2310_v49 = vadd.f32 1.0, %v3491_v43  ;;  %v3493_v60 = vpop.eup %3492 }
 0x5dc   : > { %v2312_v10 = vmul.f32 0.5, %v2309_v23  ;;  %v3495_v59 = vpop.eup %3494 }
 0x5dd   : > { %v2313_v56 = vmul.f32 0.5, %v2310_v49  ;;  %v2311_v24 = vadd.f32 1.0, %v3495_v59  ;;  %v3546_v59 = vld [vmem:[%s4998_s5 + $0x2c] ss:$16 sps:$4 sm:$0xff]  }
 0x5de   : > { %v2317_v5 = vmul.f32 %v3493_v60, %v2312_v10 }
 0x5df   : > { %v2316_v45 = vmul.f32 %v2313_v56, %v4642_v19  ;;  %v2314_v47 = vmul.f32 0.5, %v2311_v24  ;;  %v4719_v19 = vld [vmem:[%s4998_s5 + $0x20] ss:$16 sps:$4 sm:$0xff]   ;;  %v3549_v24 = vld [vmem:[%s4998_s5 + $0x48] ss:$16 sps:$4 sm:$0xff]  }
 0x5e1   : > { %v4703_v6 = vadd.f32 %v2317_v5, %v2316_v45 }
 0x5e3   : > { %3496 = vtanh.f32 %v4703_v6 }
 0x5ed   : > { %v3497_v26 = vpop.eup %3496 }
 0x5ee   : > { %v4706_v15 = vmul.f32 %v3497_v26, %v2314_v47  ;;  %v3550_v47 = vld [vmem:[%s4998_s5 + $0x6c] ss:$16 sps:$4 sm:$0xff]   ;;  %v3551_v26 = vld [vmem:[%s4998_s5 + $0x68] ss:$16 sps:$4 sm:$0xff]  }
 0x5f0   : > { %v2325_v53 = vpack.c.bf16 %v4706_v15, %v4706_v15 }
 0x5f2   : > { %2359 = vmatmul.mubr.bf16.vlgmr.msra.gmra.mrb[40].mxu0 %v2325_v53  ;;  %2400 = vmatmul.mubr.bf16.vlgmr.msra.gmra.mrb[44].mxu1 %v2325_v53  ;;  %v3552_v53 = vld [vmem:[%s4998_s5 + $0x8c] ss:$16 sps:$4 sm:$0xff]  }
 0x5f3   : > { %2436 = vmatpush1.bf16.msra.mxu0 %v4652_v48  ;;  %2477 = vmatpush1.bf16.msra.mxu1 %v4289_v28  ;;  %v4726_v28 = vld [vmem:[%s4998_s5 + $0x44] ss:$16 sps:$4 sm:$0xff]  }
 0x5f4   : > { %2437 = vmatprep.subr.bf16.mxu0 %v4659_v22  ;;  %2478 = vmatprep.subr.bf16.mxu1 %v4295_v29  ;;  %v4733_v29 = vld [vmem:[%s4998_s5 + $0x40] ss:$16 sps:$4 sm:$0xff]  }
 0x5f5   : > { %2467 = vmatprep.mubr.bf16.mxu0 %v5032_v52  ;;  %2508 = vmatprep.mubr.bf16.mxu1 %v5032_v52 }
 0x5f7   : > { %2438 = vmatpush1.bf16.msra.mxu0 %v4719_v19  ;;  %2479 = vmatpush1.bf16.msra.mxu1 %v4303_v30  ;;  %v4740_v30 = vld [vmem:[%s4998_s5 + $0x64] ss:$16 sps:$4 sm:$0xff]  }
 0x5f8   : > { %2439 = vmatprep.subr.bf16.mxu0 %v4726_v28  ;;  %2480 = vmatprep.subr.bf16.mxu1 %v4309_v31  ;;  %v4747_v31 = vld [vmem:[%s4998_s5 + $0x60] ss:$16 sps:$4 sm:$0xff]  }
 0x5fb   : > { %2440 = vmatpush1.bf16.msra.mxu0 %v4733_v29  ;;  %2481 = vmatpush1.bf16.msra.mxu1 %v4315_v32  ;;  %v4754_v32 = vld [vmem:[%s4998_s5 + $0x84] ss:$16 sps:$4 sm:$0xff]  }
 0x5fc   : > { %2441 = vmatprep.subr.bf16.mxu0 %v4740_v30  ;;  %2482 = vmatprep.subr.bf16.mxu1 %v4321_v33  ;;  %v4761_v33 = vld [vmem:[%s4998_s5 + $0x80] ss:$16 sps:$4 sm:$0xff]  }
 0x5ff   : > { %2442 = vmatpush1.bf16.msra.mxu0 %v4747_v31  ;;  %2483 = vmatpush1.bf16.msra.mxu1 %v4329_v34  ;;  %v4768_v34 = vld [vmem:[%s4998_s5 + $0xa4] ss:$16 sps:$4 sm:$0xff]  }
 0x600   : > { %2443 = vmatprep.subr.bf16.mxu0 %v4754_v32  ;;  %2484 = vmatprep.subr.bf16.mxu1 %v4335_v35  ;;  %v4775_v35 = vld [vmem:[%s4998_s5 + $0xa0] ss:$16 sps:$4 sm:$0xff]  }
 0x603   : > { %2444 = vmatpush1.bf16.msra.mxu0 %v4761_v33  ;;  %2485 = vmatpush1.bf16.msra.mxu1 %v4341_v36  ;;  %v4782_v36 = vld [vmem:[%s4998_s5 + $0xc4] ss:$16 sps:$4 sm:$0xff]  }
 0x604   : > { %2445 = vmatprep.subr.bf16.mxu0 %v4768_v34  ;;  %2486 = vmatprep.subr.bf16.mxu1 %v4347_v37  ;;  %v4789_v37 = vld [vmem:[%s4998_s5 + $0xc0] ss:$16 sps:$4 sm:$0xff]  }
 0x607   : > { %2446 = vmatpush1.bf16.msra.mxu0 %v4775_v35  ;;  %2487 = vmatpush1.bf16.msra.mxu1 %v4355_v38  ;;  %v4796_v38 = vld [vmem:[%s4998_s5 + $0xe4] ss:$16 sps:$4 sm:$0xff]  }
 0x608   : > { %2447 = vmatprep.subr.bf16.mxu0 %v4782_v36  ;;  %2488 = vmatprep.subr.bf16.mxu1 %v4361_v39  ;;  %v4803_v39 = vld [vmem:[%s4998_s5 + $0xe0] ss:$16 sps:$4 sm:$0xff]  }
 0x60b   : > { %2448 = vmatpush1.bf16.msra.mxu0 %v4789_v37  ;;  %2489 = vmatpush1.bf16.msra.mxu1 %v4367_v40  ;;  %v3544_v40 = vld [vmem:[%s4998_s5 + $0xc] ss:$16 sps:$4 sm:$0xff]  }
 0x60c   : > { %2449 = vmatprep.subr.bf16.mxu0 %v4796_v38  ;;  %2490 = vmatprep.subr.bf16.mxu1 %v4373_v41 }
 0x60f   : > { %2450 = vmatpush1.bf16.msra.mxu0 %v4803_v39  ;;  %2491 = vmatpush1.bf16.msra.mxu1 %v4380_v42 }
 0x610   : > { %2544 = vmatprep.subr.bf16.mxu0 %v4694_v57  ;;  %2585 = vmatprep.subr.bf16.mxu1 %v3544_v40  ;;  %v5046_v40 = vld [vmem:[#allocation20_spill] sm:$0xff] }
 0x6c5   : > { %v2360_v54 = vpop.f32.mrb[40].mxu0  ;;  %v2401_v51 = vpop.f32.mrb[44].mxu1 }
 0x6c6   : > { %v2408_v41 = vadd.f32 %v2360_v54, %v5041_v1  ;;  %v2410_v58 = vadd.f32 %v2401_v51, %v5042_v61  ;;  %v2362_v62 = vpop.f32.mrb[41].mxu0  ;;  %v2403_v0 = vpop.f32.mrb[45].mxu1  ;;  %v5048_v61 = vld [vmem:[#allocation21_spill] sm:$0xff] }
 0x6c7   : > { %v2409_v4 = vadd.f32 %v2362_v62, %v5043_v3  ;;  %v2411_v8 = vadd.f32 %v2403_v0, %v5044_v7  ;;  %v2364_v42 = vpop.f32.mrb[42].mxu0  ;;  %v2405_v11 = vpop.f32.mrb[46].mxu1 }
 0x6c8   : > { %v2412_v57 = vmul.f32 0.5, %v2408_v41  ;;  %v2365_v12 = vpop.f32.mrb[43].mxu0  ;;  %v2406_v16 = vpop.f32.mrb[47].mxu1  ;;  %v2414_v20 = vmul.f32 0.5, %v2410_v58  ;;  %v5047_v41 = vld [vmem:[#allocation11_spill] sm:$0xff] }
 0x6c9   : > { %v2413_v17 = vmul.f32 0.5, %v2409_v4 }
 0x6ca   : > { %3498 = vtanh.f32 %v2412_v57 }
 0x6cb   : > { %3500 = vtanh.f32 %v2413_v17 }
 0x6cc   : > { %3502 = vtanh.f32 %v2411_v8 }
 0x6cd   : > { %3504 = vtanh.f32 %v2414_v20 }
 0x6d4   : > { %v3499_v9 = vpop.eup %3498 }
 0x6d5   : > { %v2418_v44 = vadd.f32 1.0, %v3499_v9  ;;  %v3501_v63 = vpop.eup %3500 }
 0x6d6   : > { %v2419_v50 = vadd.f32 1.0, %v3501_v63  ;;  %v3503_v13 = vpop.eup %3502 }
 0x6d7   : > { %v2421_v46 = vmul.f32 0.5, %v2418_v44  ;;  %v3505_v10 = vpop.eup %3504 }
 0x6d8   : > { %v2422_v27 = vmul.f32 0.5, %v2419_v50  ;;  %v2420_v49 = vadd.f32 1.0, %v3505_v10  ;;  %v3424_v10 = vld [vmem:[%s4999_s6] ss:$8 sps:$4 sm:$0xff]  }
 0x6d9   : > { %v2426_v18 = vmul.f32 %v3503_v13, %v2421_v46 }
 0x6da   : > { %v2425_v23 = vmul.f32 %v2422_v27, %v4703_v6  ;;  %v2423_v60 = vmul.f32 0.5, %v2420_v49  ;;  %v3545_v6 = vld [vmem:[%s4998_s5 + $0x8] ss:$16 sps:$4 sm:$0xff]  }
 0x6dc   : > { %v4816_v43 = vadd.f32 %v2426_v18, %v2425_v23 }
 0x6de   : > { %3506 = vtanh.f32 %v4816_v43 }
 0x6e8   : > { %v3507_v56 = vpop.eup %3506 }
 0x6e9   : > { %v4819_v5 = vmul.f32 %v3507_v56, %v2423_v60  ;;  %v3427_v60 = vld [vmem:[%s4999_s6 + $0x10] ss:$8 sps:$4 sm:$0xff]   ;;  %v3432_v56 = vld [vmem:[%s4999_s6 + $0x24] ss:$8 sps:$4 sm:$0xff]  }
 0x6eb   : > { %v2434_v45 = vpack.c.bf16 %v4819_v5, %v4819_v5 }
 0x6ed   : > { %2468 = vmatmul.mubr.bf16.vlgmr.msra.gmra.mrb[44].mxu0 %v2434_v45  ;;  %2509 = vmatmul.mubr.bf16.vlgmr.msra.gmra.mrb[48].mxu1 %v2434_v45  ;;  %v3430_v45 = vld [vmem:[%s4999_s6 + $0x20] ss:$8 sps:$4 sm:$0xff]  }
 0x6ee   : > { %2545 = vmatpush1.bf16.msra.mxu0 %v4652_v48  ;;  %2586 = vmatpush1.bf16.msra.mxu1 %v3545_v6  ;;  %v3547_v48 = vld [vmem:[%s4998_s5 + $0x28] ss:$16 sps:$4 sm:$0xff]   ;;  %v3435_v6 = vld [vmem:[%s4999_s6 + $0x34] ss:$8 sps:$4 sm:$0xff]  }
 0x6ef   : > { %2546 = vmatprep.subr.bf16.mxu0 %v4659_v22  ;;  %2587 = vmatprep.subr.bf16.mxu1 %v3546_v59  ;;  %v3548_v22 = vld [vmem:[%s4998_s5 + $0x4c] ss:$16 sps:$4 sm:$0xff]   ;;  %v3433_v59 = vld [vmem:[%s4999_s6 + $0x30] ss:$8 sps:$4 sm:$0xff]  }
 0x6f0   : > { %2576 = vmatprep.mubr.bf16.mxu0 %v5032_v52  ;;  %2617 = vmatprep.mubr.bf16.mxu1 %v5032_v52 }
 0x6f2   : > { %2547 = vmatpush1.bf16.msra.mxu0 %v4719_v19  ;;  %2588 = vmatpush1.bf16.msra.mxu1 %v3547_v48  ;;  %v3553_v19 = vld [vmem:[%s4998_s5 + $0x88] ss:$16 sps:$4 sm:$0xff]   ;;  %v3438_v48 = vld [vmem:[%s4999_s6 + $0x44] ss:$8 sps:$4 sm:$0xff]  }
 0x6f3   : > { %2548 = vmatprep.subr.bf16.mxu0 %v4726_v28  ;;  %2589 = vmatprep.subr.bf16.mxu1 %v3548_v22  ;;  %v3554_v28 = vld [vmem:[%s4998_s5 + $0xac] ss:$16 sps:$4 sm:$0xff]   ;;  %v3436_v22 = vld [vmem:[%s4999_s6 + $0x40] ss:$8 sps:$4 sm:$0xff]  }
 0x6f6   : > { %2549 = vmatpush1.bf16.msra.mxu0 %v4733_v29  ;;  %2590 = vmatpush1.bf16.msra.mxu1 %v3549_v24  ;;  %v3555_v29 = vld [vmem:[%s4998_s5 + $0xa8] ss:$16 sps:$4 sm:$0xff]   ;;  %v3441_v24 = vld [vmem:[%s4999_s6 + $0x54] ss:$8 sps:$4 sm:$0xff]  }
 0x6f7   : > { %2550 = vmatprep.subr.bf16.mxu0 %v4740_v30  ;;  %2591 = vmatprep.subr.bf16.mxu1 %v3550_v47  ;;  %v3556_v30 = vld [vmem:[%s4998_s5 + $0xcc] ss:$16 sps:$4 sm:$0xff]   ;;  %v3439_v47 = vld [vmem:[%s4999_s6 + $0x50] ss:$8 sps:$4 sm:$0xff]  }
 0x6fa   : > { %2551 = vmatpush1.bf16.msra.mxu0 %v4747_v31  ;;  %2592 = vmatpush1.bf16.msra.mxu1 %v3551_v26  ;;  %v3557_v31 = vld [vmem:[%s4998_s5 + $0xc8] ss:$16 sps:$4 sm:$0xff]   ;;  %v3444_v26 = vld [vmem:[%s4999_s6 + $0x64] ss:$8 sps:$4 sm:$0xff]  }
 0x6fb   : > { %2552 = vmatprep.subr.bf16.mxu0 %v4754_v32  ;;  %2593 = vmatprep.subr.bf16.mxu1 %v3552_v53  ;;  %v3558_v32 = vld [vmem:[%s4998_s5 + $0xec] ss:$16 sps:$4 sm:$0xff]   ;;  %v3442_v53 = vld [vmem:[%s4999_s6 + $0x60] ss:$8 sps:$4 sm:$0xff]  }
 0x6fe   : > { %2553 = vmatpush1.bf16.msra.mxu0 %v4761_v33  ;;  %2594 = vmatpush1.bf16.msra.mxu1 %v3553_v19  ;;  %v3559_v33 = vld [vmem:[%s4998_s5 + $0xe8] ss:$16 sps:$4 sm:$0xff]   ;;  %v3447_v19 = vld [vmem:[%s4999_s6 + $0x74] ss:$8 sps:$4 sm:$0xff]  }
 0x6ff   : > { %2554 = vmatprep.subr.bf16.mxu0 %v4768_v34  ;;  %2595 = vmatprep.subr.bf16.mxu1 %v3554_v28  ;;  %v3426_v34 = vld [vmem:[%s4999_s6 + $0x4] ss:$8 sps:$4 sm:$0xff]   ;;  %v3445_v28 = vld [vmem:[%s4999_s6 + $0x70] ss:$8 sps:$4 sm:$0xff]  }
 0x702   : > { %2555 = vmatpush1.bf16.msra.mxu0 %v4775_v35  ;;  %2596 = vmatpush1.bf16.msra.mxu1 %v3555_v29  ;;  %v2648_v29 = vpack.c.bf16 %v4553_v21, %v4507_v14 }
 0x703   : > { %2556 = vmatprep.subr.bf16.mxu0 %v4782_v36  ;;  %2597 = vmatprep.subr.bf16.mxu1 %v3556_v30  ;;  %v2649_v30 = vpack.c.bf16 %v4645_v55, %v4599_v25  ;;  %v5051_v25 = vld [vmem:[#allocation22_spill] sm:$0xff] }
 0x706   : > { %2557 = vmatpush1.bf16.msra.mxu0 %v4789_v37  ;;  %2598 = vmatpush1.bf16.msra.mxu1 %v3557_v31  ;;  %v5045_v37 = vld [vmem:[#allocation10_spill] sm:$0xff]  ;;  %v2650_v31 = vpack.c.bf16 %v4819_v5, %v4706_v15 }
 0x707   : > { %2558 = vmatprep.subr.bf16.mxu0 %v4796_v38  ;;  %2599 = vmatprep.subr.bf16.mxu1 %v3558_v32 }
 0x70a   : > { %2559 = vmatpush1.bf16.msra.mxu0 %v4803_v39  ;;  %2600 = vmatpush1.bf16.msra.mxu1 %v3559_v33 }
 0x70b   : > { %2760 = vmatprep.subr.bf16.mxu0 %v3426_v34  ;;  %v5049_v34 = vld [vmem:[#allocation12_spill] sm:$0xff] }
 0x7c0   : > { %v2469_v35 = vpop.f32.mrb[44].mxu0  ;;  %v2510_v36 = vpop.f32.mrb[48].mxu1 }
 0x7c1   : > { %v2517_v38 = vadd.f32 %v2469_v35, %v5045_v37  ;;  %v2519_v54 = vadd.f32 %v2510_v36, %v5046_v40  ;;  %v2471_v51 = vpop.f32.mrb[45].mxu0  ;;  %v2512_v1 = vpop.f32.mrb[49].mxu1  ;;  %v5050_v37 = vld [vmem:[#allocation13_spill] sm:$0xff] }
 0x7c2   : > { %v2518_v39 = vadd.f32 %v2471_v51, %v5047_v41  ;;  %v2520_v58 = vadd.f32 %v2512_v1, %v5048_v61  ;;  %v2473_v62 = vpop.f32.mrb[46].mxu0  ;;  %v2514_v0 = vpop.f32.mrb[50].mxu1 }
 0x7c3   : > { %v2521_v3 = vmul.f32 0.5, %v2517_v38  ;;  %v2474_v4 = vpop.f32.mrb[47].mxu0  ;;  %v2515_v7 = vpop.f32.mrb[51].mxu1  ;;  %v2523_v42 = vmul.f32 0.5, %v2519_v54 }
 0x7c4   : > { %v2522_v8 = vmul.f32 0.5, %v2518_v39 }
 0x7c5   : > { %3508 = vtanh.f32 %v2521_v3 }
 0x7c6   : > { %3510 = vtanh.f32 %v2522_v8  ;;  %v2668_v8 = vld [vmem:[%s5000_s7] sm:$0x3] }
 0x7c7   : > { %3512 = vtanh.f32 %v2520_v58 }
 0x7c8   : > { %3514 = vtanh.f32 %v2523_v42 }
 0x7cf   : > { %v3509_v11 = vpop.eup %3508 }
 0x7d0   : > { %v2527_v57 = vadd.f32 1.0, %v3509_v11  ;;  %v3511_v12 = vpop.eup %3510  ;;  %v5052_v11 = vld [vmem:[#allocation3_spill] sm:$0xff] }
 0x7d1   : > { %v2528_v17 = vadd.f32 1.0, %v3511_v12  ;;  %v3513_v20 = vpop.eup %3512 }
 0x7d2   : > { %v2530_v16 = vmul.f32 0.5, %v2527_v57  ;;  %v3515_v50 = vpop.eup %3514  ;;  %v5053_v57 = vsub.s32 0, %v5052_v11 }
 0x7d3   : > { %v2531_v9 = vmul.f32 0.5, %v2528_v17  ;;  %v2529_v13 = vadd.f32 1.0, %v3515_v50 }
 0x7d4   : > { %v2535_v44 = vmul.f32 %v3513_v20, %v2530_v16  ;;  %v2673_v12 = vrot.slane %v2668_v8, %v5053_v57  ;;  %v5054_v16 = vsub.s32 1, %v5052_v11 }
 0x7d5   : > { %v2534_v63 = vmul.f32 %v2531_v9, %v4816_v43  ;;  %v2532_v27 = vmul.f32 0.5, %v2529_v13  ;;  %v3429_v43 = vld [vmem:[%s4999_s6 + $0x14] ss:$8 sps:$4 sm:$0xff]  }
 0x7d6   : > { %v2677_v17 = vrot.slane %v2668_v8, %v5054_v16 }
 0x7d7   : > { %v4893_v46 = vadd.f32 %v2535_v44, %v2534_v63 }
 0x7d9   : > { %3516 = vtanh.f32 %v4893_v46 }
 0x7e3   : > { %v3517_v18 = vpop.eup %3516 }
 0x7e4   : > { %v4896_v23 = vmul.f32 %v3517_v18, %v2532_v27 }
 0x7e6   : > { %v2543_v49 = vpack.c.bf16 %v4896_v23, %v4896_v23 }
 0x7e8   : > { %2577 = vmatmul.mubr.bf16.vlgmr.msra.gmra.mrb[48].mxu0 %v2543_v49  ;;  %2618 = vmatmul.mubr.bf16.vlgmr.msra.gmra.mrb[52].mxu1 %v2543_v49 }
 0x7e9   : > { %2761 = vmatpush1.bf16.msra.mxu0 %v3424_v10  ;;  %2792 = vmatprep.mubr.bf16.mxu0 %v5032_v52 }
 0x7ea   : > { %2762 = vmatprep.subr.bf16.mxu0 %v3429_v43 }
 0x7ed   : > { %2763 = vmatpush1.bf16.msra.mxu0 %v3427_v60 }
 0x7ee   : > { %2764 = vmatprep.subr.bf16.mxu0 %v3432_v56 }
 0x7f1   : > { %2765 = vmatpush1.bf16.msra.mxu0 %v3430_v45 }
 0x7f2   : > { %2766 = vmatprep.subr.bf16.mxu0 %v3435_v6 }
 0x7f5   : > { %2767 = vmatpush1.bf16.msra.mxu0 %v3433_v59 }
 0x7f6   : > { %2768 = vmatprep.subr.bf16.mxu0 %v3438_v48 }
 0x7f9   : > { %2769 = vmatpush1.bf16.msra.mxu0 %v3436_v22 }
 0x7fa   : > { %2770 = vmatprep.subr.bf16.mxu0 %v3441_v24 }
 0x7fd   : > { %2771 = vmatpush1.bf16.msra.mxu0 %v3439_v47 }
 0x7fe   : > { %2772 = vmatprep.subr.bf16.mxu0 %v3444_v26 }
 0x801   : > { %2773 = vmatpush1.bf16.msra.mxu0 %v3442_v53 }
 0x802   : > { %2774 = vmatprep.subr.bf16.mxu0 %v3447_v19 }
 0x805   : > { %2775 = vmatpush1.bf16.msra.mxu0 %v3445_v28 }
 0x808   : > { %2793 = vmatmul.mubr.bf16.vlgmr.msra.gmra.mrb[52].mxu0 %v2648_v29 }
 0x809   : > { %2802 = vmatprep.mubr.bf16.mxu0 %v5032_v52 }
 0x810   : > { %2803 = vmatmul.mubr.bf16.gmra.mrb[56].mxu0 %v2649_v30 }
 0x811   : > { %2812 = vmatprep.mubr.bf16.mxu0 %v5032_v52 }
 0x818   : > { %2813 = vmatmul.mubr.bf16.gmra.mrb[60].mxu0 %v2650_v31 }
 0x819   : > { %2822 = vmatprep.mubr.bf16.mxu0 %v5032_v52 }
 0x8bb   : > { %v2578_v32 = vpop.f32.mrb[48].mxu0  ;;  %v2619_v33 = vpop.f32.mrb[52].mxu1 }
 0x8bc   : > { %v2626_v35 = vadd.f32 %v2578_v32, %v5049_v34  ;;  %v2628_v14 = vadd.f32 %v2619_v33, %v4494_v2  ;;  %v2580_v21 = vpop.f32.mrb[49].mxu0  ;;  %v2621_v36 = vpop.f32.mrb[53].mxu1 }
 0x8bd   : > { %v2627_v38 = vadd.f32 %v2580_v21, %v5050_v37  ;;  %v2629_v55 = vadd.f32 %v2621_v36, %v5051_v25  ;;  %v2582_v40 = vpop.f32.mrb[50].mxu0  ;;  %v2623_v54 = vpop.f32.mrb[54].mxu1 }
 0x8be   : > { %v2630_v51 = vmul.f32 0.5, %v2626_v35  ;;  %v2583_v1 = vpop.f32.mrb[51].mxu0  ;;  %v2624_v15 = vpop.f32.mrb[55].mxu1  ;;  %v2632_v52 = vmul.f32 0.5, %v2628_v14 }
 0x8bf   : > { %v2631_v5 = vmul.f32 0.5, %v2627_v38 }
 0x8c0   : > { %3518 = vtanh.f32 %v2630_v51 }
 0x8c1   : > { %3520 = vtanh.f32 %v2631_v5 }
 0x8c2   : > { %3522 = vtanh.f32 %v2629_v55 }
 0x8c3   : > { %3524 = vtanh.f32 %v2632_v52 }
 0x8ca   : > { %v3519_v41 = vpop.eup %3518 }
 0x8cb   : > { %v2636_v39 = vadd.f32 1.0, %v3519_v41  ;;  %v3521_v2 = vpop.eup %3520 }
 0x8cc   : > { %v2637_v58 = vadd.f32 1.0, %v3521_v2  ;;  %v3523_v62 = vpop.eup %3522 }
 0x8cd   : > { %v2639_v61 = vmul.f32 0.5, %v2636_v39  ;;  %v3525_v42 = vpop.eup %3524 }
 0x8ce   : > { %v2640_v0 = vmul.f32 0.5, %v2637_v58  ;;  %v2638_v20 = vadd.f32 1.0, %v3525_v42 }
 0x8cf   : > { %v2644_v3 = vmul.f32 %v3523_v62, %v2639_v61 }
 0x8d0   : > { %v2643_v4 = vmul.f32 %v2640_v0, %v4893_v46  ;;  %v2641_v13 = vmul.f32 0.5, %v2638_v20 }
 0x8d2   : > { %v2645_v7 = vadd.f32 %v2644_v3, %v2643_v4 }
 0x8d4   : > { %3526 = vtanh.f32 %v2645_v7 }
 0x8db   : > { %v2794_v9 = vpop.f32.mrb[52].mxu0 }
 0x8dc   : > { %v2795_v44 = vadd.f32 %v2794_v9, %v2673_v12  ;;  %v2796_v63 = vpop.f32.mrb[53].mxu0 }
 0x8dd   : > { %v2797_v46 = vadd.f32 %v2796_v63, %v2677_v17  ;;  %v2798_v50 = vpop.f32.mrb[54].mxu0 }
 0x8de   : > { %2833 = vst [vmem:[%s4971_s22] sm:$0xff] %v2795_v44  ;;  %v2799_v27 = vadd.f32 %v2798_v50, %v2673_v12  ;;  %v2800_v18 = vpop.f32.mrb[55].mxu0  ;;  %v3527_v10 = vpop.eup %3526 }
 0x8df   : > { %2834 = vst [vmem:[%s4971_s22 + $0x8] sm:$0xff] %v2797_v46  ;;  %v2801_v49 = vadd.f32 %v2800_v18, %v2677_v17  ;;  %v2647_v43 = vmul.f32 %v3527_v10, %v2641_v13 }
 0x8e0   : > { %2835 = vst [vmem:[%s4971_s22 + $0x10] sm:$0xff] %v2799_v27 }
 0x8e1   : > { %2836 = vst [vmem:[%s4971_s22 + $0x18] sm:$0xff] %v2801_v49  ;;  %v2651_v60 = vpack.c.bf16 %v2647_v43, %v4896_v23 }
 0x8e3   : > { %v2804_v56 = vpop.f32.mrb[56].mxu0  ;;  %2823 = vmatmul.mubr.bf16.gmra.mrb[64].mxu0 %v2651_v60 }
 0x8e4   : > { %v2805_v45 = vadd.f32 %v2804_v56, %v2673_v12  ;;  %v2806_v6 = vpop.f32.mrb[57].mxu0 }
 0x8e5   : > { %v2807_v59 = vadd.f32 %v2806_v6, %v2677_v17  ;;  %v2808_v48 = vpop.f32.mrb[58].mxu0 }
 0x8e6   : > { %2837 = vst [vmem:[%s4971_s22 + $0x20] sm:$0xff] %v2805_v45  ;;  %v2809_v22 = vadd.f32 %v2808_v48, %v2673_v12  ;;  %v2810_v24 = vpop.f32.mrb[59].mxu0 }
 0x8e7   : > { %2838 = vst [vmem:[%s4971_s22 + $0x28] sm:$0xff] %v2807_v59  ;;  %v2811_v47 = vadd.f32 %v2810_v24, %v2677_v17 }
 0x8e8   : > { %2839 = vst [vmem:[%s4971_s22 + $0x30] sm:$0xff] %v2809_v22 }
 0x8e9   : > { %2840 = vst [vmem:[%s4971_s22 + $0x38] sm:$0xff] %v2811_v47 }
 0x8eb   : > { %v2814_v26 = vpop.f32.mrb[60].mxu0 }
 0x8ec   : > { %v2815_v53 = vadd.f32 %v2814_v26, %v2673_v12  ;;  %v2816_v23 = vpop.f32.mrb[61].mxu0 }
 0x8ed   : > { %v2817_v19 = vadd.f32 %v2816_v23, %v2677_v17  ;;  %v2818_v28 = vpop.f32.mrb[62].mxu0 }
 0x8ee   : > { %2841 = vst [vmem:[%s4971_s22 + $0x40] sm:$0xff] %v2815_v53  ;;  %v2819_v29 = vadd.f32 %v2818_v28, %v2673_v12  ;;  %v2820_v30 = vpop.f32.mrb[63].mxu0 }
 0x8ef   : > { %2842 = vst [vmem:[%s4971_s22 + $0x48] sm:$0xff] %v2817_v19  ;;  %v2821_v31 = vadd.f32 %v2820_v30, %v2677_v17 }
 0x8f0   : > { %2843 = vst [vmem:[%s4971_s22 + $0x50] sm:$0xff] %v2819_v29 }
 0x8f1   : > { %2844 = vst [vmem:[%s4971_s22 + $0x58] sm:$0xff] %v2821_v31 }
 0x9b6   : > { %v2824_v32 = vpop.f32.mrb[64].mxu0 }
 0x9b7   : > { %v2825_v33 = vadd.f32 %v2824_v32, %v2673_v12  ;;  %v2826_v34 = vpop.f32.mrb[65].mxu0 }
 0x9b8   : > { %v2827_v35 = vadd.f32 %v2826_v34, %v2677_v17  ;;  %v2828_v14 = vpop.f32.mrb[66].mxu0 }
 0x9b9   : > { %2845 = vst [vmem:[%s4971_s22 + $0x60] sm:$0xff] %v2825_v33  ;;  %v2829_v21 = vadd.f32 %v2828_v14, %v2673_v12  ;;  %v2830_v36 = vpop.f32.mrb[67].mxu0 }
 0x9ba   : > { %2846 = vst [vmem:[%s4971_s22 + $0x68] sm:$0xff] %v2827_v35  ;;  %v2831_v37 = vadd.f32 %v2830_v36, %v2677_v17 }
 0x9bb   : > { %2847 = vst [vmem:[%s4971_s22 + $0x70] sm:$0xff] %v2829_v21 }
 0x9bc   : > { %2848 = vst [vmem:[%s4971_s22 + $0x78] sm:$0xff] %v2831_v37 }
 0x9bd PF: > { %s22_s21 = sadd.s32 1, %s3566_s21  }
 0x9be   : > { %p19_p5 = scmp.ge.s32.totalorder %s22_s21, 4  }
 0x9c0   :  { %21 = sbr.rel (!%p19_p5) target bundleno = 1 (0x1), region = 101 }

</bundles_post_ra>
